<compile_context>
chip_gen: v6e
topology: v6e:2x2x1
jax: 0.10.0
libtpu: 0.0.40
codegen_flags: <defaults>
</compile_context>

<pallas_src>
import functools

import jax
import jax.numpy as jnp
from jax import lax
from jax.experimental import pallas as pl
from jax.experimental.pallas import tpu as pltpu


# ---------------------------------------------------------------------------
# Pallas kernel (one batch element per grid step; (C, T) layout)
# ---------------------------------------------------------------------------
def make_coupling_kernel(*, T, H, half, kernel_size, dilation_rate, n_layers,
                         max_pad, reverse, compute_dtype):
    K, L = kernel_size, n_layers
    cdt = compute_dtype
    f32 = jnp.float32

    def kernel(x_ref, mask_ref, w_pre_ref, b_pre_ref, w_in_ref, b_in_ref,
               w_rs_ref, b_rs_ref, w_post_ref, b_post_ref, out_ref, *rest):
        if reverse:
            (hpad_ref,) = rest
            ld_ref = None
        else:
            ld_ref, hpad_ref = rest

        xb = x_ref[0]                      # (C, T)  f32
        mask = mask_ref[0]                 # (1, T)  f32
        x0 = xb[:half, :]                  # (half, T) passthrough (exact copy)
        x1 = xb[half:, :]                  # (half, T)

        # Zero only the conv halo lanes.  Done every step (cheap: 2*max_pad
        # lanes) so the kernel stays correct even when the batch axis is
        # sharded across TensorCores; the T middle lanes are fully overwritten
        # before every read below.
        if max_pad > 0:
            hpad_ref[:, :max_pad] = jnp.zeros((H, max_pad), cdt)
            hpad_ref[:, T + max_pad:] = jnp.zeros((H, max_pad), cdt)

        # ---- pre: 1x1 conv == channel matmul --------------------------------
        h = (jnp.dot(w_pre_ref[...], x0.astype(cdt),
                     preferred_element_type=f32)
             + b_pre_ref[...]) * mask                          # (H, T) f32

        # ---- WN encoder (gin_channels=0, p_dropout=0 => dropout identity) ---
        out_acc = jnp.zeros((H, T), f32)
        for i in range(L):
            dil = dilation_rate ** i
            pad = (K - 1) * dil // 2
            # masked hidden state into the zero-halo'd time buffer
            hpad_ref[:, max_pad:max_pad + T] = h.astype(cdt)
            # dilated conv = K accumulated per-tap matmuls on shifted windows
            xin = jnp.zeros((2 * H, T), f32)
            for k in range(K):
                off = max_pad + k * dil - pad                  # static, >= 0
                tap = hpad_ref[:, off:off + T]                 # (H, T) cdt
                xin = xin + jnp.dot(w_in_ref[i * K + k], tap,
                                    preferred_element_type=f32)
            xin = xin + b_in_ref[i]                            # (2H, T)
            # gated activation; heads packed contiguously [0:H]|[H:2H]
            acts = jnp.tanh(xin[:H, :]) * jax.nn.sigmoid(xin[H:, :])
            acts_c = acts.astype(cdt)
            if i < L - 1:
                rs = (jnp.dot(w_rs_ref[i], acts_c,
                              preferred_element_type=f32)
                      + b_rs_ref[i])                           # (2H, T) res|skip
                h = (h + rs[:H, :]) * mask
                out_acc = out_acc + rs[H:, :]
            else:
                # last WN layer has a skip head only -> half-size matmul
                rs = (jnp.dot(w_rs_ref[i][:H, :], acts_c,
                              preferred_element_type=f32)
                      + b_rs_ref[i][:H, :])                    # (H, T)
                out_acc = out_acc + rs
        out_acc = out_acc * mask

        # ---- post: 1x1 conv, fused mean|log-scale heads ----------------------
        stats = (jnp.dot(w_post_ref[...], out_acc.astype(cdt),
                         preferred_element_type=f32)
                 + b_post_ref[...]) * mask                     # (2*half, T)
        m = stats[:half, :]
        logs = stats[half:, :]

        # ---- affine coupling -------------------------------------------------
        if not reverse:
            x1_new = m + x1 * jnp.exp(logs) * mask
            # per-batch partial logdet (channel sum); finished in the wrapper
            ld_ref[0] = jnp.sum(logs, axis=0, keepdims=True)   # (1, T)
        else:
            x1_new = (x1 - m) * jnp.exp(-logs) * mask
        out_ref[0] = jnp.concatenate([x0, x1_new], axis=0).astype(out_ref.dtype)

    return kernel


# ---------------------------------------------------------------------------
# Wrapper (parameter repacking only -- no activation layout passes)
# ---------------------------------------------------------------------------
def residual_coupling_forward(x, x_mask, params, *, kernel_size, dilation_rate,
                              n_layers, mean_only=False, reverse=False,
                              compute_dtype=jnp.bfloat16):
    """x: (B, C, T) (PyTorch NCT), x_mask: (B, 1, T).

    Returns (x_out, logdet) in forward mode, x_out in reverse mode.
    """
    f32 = jnp.float32
    cdt = compute_dtype
    B, C, T = x.shape
    half = C // 2
    H = params['w_pre'].shape[0]
    K, L = kernel_size, n_layers
    max_pad = max((K - 1) * (dilation_rate ** i) // 2 for i in range(L))
    T_pad = T + 2 * max_pad

    x = x.astype(f32)
    x_mask = x_mask.astype(f32)

    # ---- repack torch-layout weights: all (out_ch, in_ch), no transposes ----
    w_pre_k = params['w_pre'].astype(cdt)                        # (H, half)
    b_pre_k = params['b_pre'].astype(f32).reshape(H, 1)

    w_in_k = jnp.stack([params['w_in'][i].astype(f32)[:, :, k]
                        for i in range(L) for k in range(K)]
                       ).astype(cdt)                             # (L*K, 2H, H)
    b_in_k = jnp.stack([params['b_in'][i].astype(f32)
                        for i in range(L)]).reshape(L, 2 * H, 1)

    w_rs_l, b_rs_l = [], []
    for i in range(L):
        w = params['w_rs'][i].astype(f32)       # (2H, H), last layer (H, H)
        b = params['b_rs'][i].astype(f32)
        if i == L - 1:                           # last layer: skip head only
            w = jnp.concatenate([w, jnp.zeros((H, H), f32)], axis=0)
            b = jnp.concatenate([b, jnp.zeros((H,), f32)], axis=0)
        w_rs_l.append(w)
        b_rs_l.append(b)
    w_rs_k = jnp.stack(w_rs_l).astype(cdt)                       # (L, 2H, H)
    b_rs_k = jnp.stack(b_rs_l).reshape(L, 2 * H, 1)

    w_post = params['w_post'].astype(f32)        # (half*(2-mean_only), H)
    b_post = params['b_post'].astype(f32)
    if mean_only:                                # log-scale head fixed to zero
        w_post = jnp.concatenate([w_post, jnp.zeros((half, H), f32)], axis=0)
        b_post = jnp.concatenate([b_post, jnp.zeros((half,), f32)], axis=0)
    w_post_k = w_post.astype(cdt)                # (2*half, H) rows: mean|logs
    b_post_k = b_post.reshape(2 * half, 1)

    # ---- pallas_call: grid over batch, weights resident ----------------------
    kern = make_coupling_kernel(T=T, H=H, half=half, kernel_size=K,
                                dilation_rate=dilation_rate, n_layers=L,
                                max_pad=max_pad, reverse=reverse,
                                compute_dtype=cdt)

    bmap = lambda b: (b, 0, 0)
    c2 = lambda b: (0, 0)
    c3 = lambda b: (0, 0, 0)

    in_specs = [
        pl.BlockSpec((1, C, T), bmap),            # x (x0|x1 rows, NCT as-is)
        pl.BlockSpec((1, 1, T), bmap),            # mask
        pl.BlockSpec((H, half), c2),              # w_pre
        pl.BlockSpec((H, 1), c2),                 # b_pre
        pl.BlockSpec((L * K, 2 * H, H), c3),      # w_in, one (2H,H) slab per tap
        pl.BlockSpec((L, 2 * H, 1), c3),          # b_in
        pl.BlockSpec((L, 2 * H, H), c3),          # w_res|skip
        pl.BlockSpec((L, 2 * H, 1), c3),          # b_res|skip
        pl.BlockSpec((2 * half, H), c2),          # w_post (mean|logs rows)
        pl.BlockSpec((2 * half, 1), c2),          # b_post
    ]
    scratch_shapes = [pltpu.VMEM((H, T_pad), cdt)]   # zero-halo'd time buffer
    args = (x, x_mask, w_pre_k, b_pre_k, w_in_k, b_in_k,
            w_rs_k, b_rs_k, w_post_k, b_post_k)

    if not reverse:
        out_shape = (jax.ShapeDtypeStruct((B, C, T), f32),
                     jax.ShapeDtypeStruct((B, 1, T), f32))
        out_specs = (pl.BlockSpec((1, C, T), bmap),
                     pl.BlockSpec((1, 1, T), bmap))
    else:
        out_shape = jax.ShapeDtypeStruct((B, C, T), f32)
        out_specs = pl.BlockSpec((1, C, T), bmap)

    result = pl.pallas_call(
        kern,
        out_shape=out_shape,
        grid=(B,),
        in_specs=in_specs,
        out_specs=out_specs,
        scratch_shapes=scratch_shapes,
        compiler_params=pltpu.CompilerParams(
            dimension_semantics=("parallel",),       # batch over TCs (v7x)
            vmem_limit_bytes=64 * 1024 * 1024),      # > 16/32 MiB scoped defaults
    )(*args)

    if reverse:
        return result
    x_out, ld_part = result
    logdet = jnp.sum(ld_part[:, 0, :], axis=-1)
    return x_out, logdet


# ---------------------------------------------------------------------------
# Deterministic parameter init (shapes follow the PyTorch module's __init__)
# ---------------------------------------------------------------------------
def init_params(key, channels, hidden, kernel_size, n_layers, mean_only=False):
    half = channels // 2
    H, K = hidden, kernel_size
    keys = iter(jax.random.split(key, 2 + 4 * n_layers))

    def nrm(shape, scale=0.1):
        return scale * jax.random.normal(next(keys), shape, jnp.float32)

    params = {
        'w_pre': nrm((H, half)),      # Conv1d(half, H, 1) weight (kernel dim squeezed)
        'b_pre': nrm((H,)),
        'w_in': [], 'b_in': [], 'w_rs': [], 'b_rs': [],
    }
    for i in range(n_layers):
        params['w_in'].append(nrm((2 * H, H, K)))             # dilated conv weight
        params['b_in'].append(nrm((2 * H,)))
        rs_ch = 2 * H if i < n_layers - 1 else H
        params['w_rs'].append(nrm((rs_ch, H)))                # 1x1 res/skip conv
        params['b_rs'].append(nrm((rs_ch,)))
    c_post = half * (2 - int(mean_only))
    params['w_post'] = jnp.zeros((c_post, H), jnp.float32)    # module zero-inits post
    params['b_post'] = jnp.zeros((c_post,), jnp.float32)
    return params


# ---------------------------------------------------------------------------
# Plain-JAX reference (independent of the kernel; NCT layout like PyTorch)
# ---------------------------------------------------------------------------
def ref_forward(x, x_mask, params, *, kernel_size, dilation_rate, n_layers,
                mean_only=False, reverse=False):
    half = x.shape[1] // 2
    H, K = params['w_pre'].shape[0], kernel_size

    def conv1x1(v, w, b):
        return jnp.einsum('bct,oc->bot', v, w) + b[None, :, None]

    x0, x1 = x[:, :half], x[:, half:]
    h = conv1x1(x0, params['w_pre'], params['b_pre']) * x_mask
    output = jnp.zeros_like(h)
    for i in range(n_layers):
        dil = dilation_rate ** i
        pad = (K * dil - dil) // 2
        x_in = lax.conv_general_dilated(
            h, params['w_in'][i], window_strides=(1,), padding=[(pad, pad)],
            rhs_dilation=(dil,), dimension_numbers=('NCH', 'OIH', 'NCH'))
        x_in = x_in + params['b_in'][i][None, :, None]
        acts = jnp.tanh(x_in[:, :H]) * jax.nn.sigmoid(x_in[:, H:])
        rs = conv1x1(acts, params['w_rs'][i], params['b_rs'][i])
        if i < n_layers - 1:
            h = (h + rs[:, :H]) * x_mask
            output = output + rs[:, H:]
        else:
            output = output + rs
    output = output * x_mask
    stats = conv1x1(output, params['w_post'], params['b_post']) * x_mask
    if not mean_only:
        m, logs = stats[:, :half], stats[:, half:]
    else:
        m, logs = stats, jnp.zeros_like(stats)
    if not reverse:
        x1n = m + x1 * jnp.exp(logs) * x_mask
        return jnp.concatenate([x0, x1n], axis=1), jnp.sum(logs, axis=(1, 2))
    x1n = (x1 - m) * jnp.exp(-logs) * x_mask
    return jnp.concatenate([x0, x1n], axis=1)


# ---------------------------------------------------------------------------
if __name__ == "__main__":
    B, channels, T = 2, 4, 16
    hidden, K, dil_rate, n_layers = 32, 5, 1, 2

    key = jax.random.PRNGKey(0)
    k_x, k_p, k_w, k_b = jax.random.split(key, 4)
    x = jax.random.normal(k_x, (B, channels, T), jnp.float32)          # NCT
    lengths = jnp.array([T, T - 4])
    x_mask = (jnp.arange(T)[None, :] < lengths[:, None]).astype(jnp.float32)[:, None, :]

    params = init_params(k_p, channels, hidden, K, n_layers)

    run_f32 = functools.partial(residual_coupling_forward, kernel_size=K,
                                dilation_rate=dil_rate, n_layers=n_layers,
                                compute_dtype=jnp.float32)
    run_bf16 = functools.partial(residual_coupling_forward, kernel_size=K,
                                 dilation_rate=dil_rate, n_layers=n_layers,
                                 compute_dtype=jnp.bfloat16)
    ref = functools.partial(ref_forward, kernel_size=K,
                            dilation_rate=dil_rate, n_layers=n_layers)

    # 1) faithful module init (post conv zero-initialized), f32 MXU path
    x_out, logdet = run_f32(x, x_mask, params)
    jax.block_until_ready((x_out, logdet))
    x_r, ld_r = ref(x, x_mask, params)
    assert jnp.allclose(x_out, x_r, atol=1e-4, rtol=1e-4)
    assert jnp.allclose(logdet, ld_r, atol=1e-4, rtol=1e-4)

    # 2) non-zero post weights, f32 MXU path (tight check of the full WN chain)
    params_nz = dict(params)
    params_nz['w_post'] = 0.05 * jax.random.normal(k_w, params['w_post'].shape, jnp.float32)
    params_nz['b_post'] = 0.05 * jax.random.normal(k_b, params['b_post'].shape, jnp.float32)
    x_out2, logdet2 = run_f32(x, x_mask, params_nz)
    jax.block_until_ready((x_out2, logdet2))
    x_r2, ld_r2 = ref(x, x_mask, params_nz)
    assert jnp.allclose(x_out2, x_r2, atol=1e-4, rtol=1e-4)
    assert jnp.allclose(logdet2, ld_r2, atol=1e-4, rtol=1e-4)

    # 3) default bf16 MXU path (f32 accumulation) vs f32 reference, looser tol
    x_out3, logdet3 = run_bf16(x, x_mask, params_nz)
    jax.block_until_ready((x_out3, logdet3))
    assert jnp.allclose(x_out3, x_r2, atol=1e-1, rtol=1e-1)
    assert jnp.allclose(logdet3, ld_r2, atol=1e-1, rtol=1e-1)

    # 4) reverse path round-trip (valid where mask == 1), bf16 path
    x_rec = run_bf16(x_out3, x_mask, params_nz, reverse=True)
    jax.block_until_ready(x_rec)
    assert jnp.allclose(x_rec * x_mask, x * x_mask, atol=1e-3, rtol=1e-3)

    print("KERNEL_OK")
</pallas_src>

<mosaic_0001>
module attributes {stable_mosaic.version = 11 : i64} {
  func.func @kernel(%arg0: i32, %arg1: memref<1x4x16xf32, #tpu.memory_space<vmem>>, %arg2: memref<1x1x16xf32, #tpu.memory_space<vmem>>, %arg3: memref<32x2xf32, #tpu.memory_space<vmem>>, %arg4: memref<32x1xf32, #tpu.memory_space<vmem>>, %arg5: memref<10x64x32xf32, #tpu.memory_space<vmem>>, %arg6: memref<2x64x1xf32, #tpu.memory_space<vmem>>, %arg7: memref<2x64x32xf32, #tpu.memory_space<vmem>>, %arg8: memref<2x64x1xf32, #tpu.memory_space<vmem>>, %arg9: memref<4x32xf32, #tpu.memory_space<vmem>>, %arg10: memref<4x1xf32, #tpu.memory_space<vmem>>, %arg11: memref<1x4x16xf32, #tpu.memory_space<vmem>>, %arg12: memref<1x1x16xf32, #tpu.memory_space<vmem>>, %arg13: memref<32x20xf32, #tpu.memory_space<vmem>>) attributes {dimension_semantics = [#tpu.dimension_semantics<parallel>], iteration_bounds = array<i64: 2>, scalar_prefetch = 0 : i64, scratch_operands = 1 : i64, tpu.core_type = #tpu.core_type<tc>, window_params = [{transform_indices = @transform_0, window_bounds = array<i64: 1, 4, 16>}, {transform_indices = @transform_1, window_bounds = array<i64: 1, 1, 16>}, {pipeline_mode = #tpu.pipeline_mode<synchronous>, transform_indices = @transform_2, window_bounds = array<i64: 32, 2>}, {pipeline_mode = #tpu.pipeline_mode<synchronous>, transform_indices = @transform_3, window_bounds = array<i64: 32, 1>}, {pipeline_mode = #tpu.pipeline_mode<synchronous>, transform_indices = @transform_4, window_bounds = array<i64: 10, 64, 32>}, {pipeline_mode = #tpu.pipeline_mode<synchronous>, transform_indices = @transform_5, window_bounds = array<i64: 2, 64, 1>}, {pipeline_mode = #tpu.pipeline_mode<synchronous>, transform_indices = @transform_6, window_bounds = array<i64: 2, 64, 32>}, {pipeline_mode = #tpu.pipeline_mode<synchronous>, transform_indices = @transform_7, window_bounds = array<i64: 2, 64, 1>}, {pipeline_mode = #tpu.pipeline_mode<synchronous>, transform_indices = @transform_8, window_bounds = array<i64: 4, 32>}, {pipeline_mode = #tpu.pipeline_mode<synchronous>, transform_indices = @transform_9, window_bounds = array<i64: 4, 1>}, {transform_indices = @transform_10, window_bounds = array<i64: 1, 4, 16>}, {transform_indices = @transform_11, window_bounds = array<i64: 1, 1, 16>}]} {
    %c0 = arith.constant 0 : index
    %c0_0 = arith.constant 0 : index
    %c0_1 = arith.constant 0 : index
    %0 = vector.load %arg1[%c0, %c0_0, %c0_1] : memref<1x4x16xf32, #tpu.memory_space<vmem>>, vector<1x4x16xf32>
    %1 = vector.shape_cast %0 : vector<1x4x16xf32> to vector<4x16xf32>
    %c0_2 = arith.constant 0 : index
    %c0_3 = arith.constant 0 : index
    %c0_4 = arith.constant 0 : index
    %2 = vector.load %arg2[%c0_2, %c0_3, %c0_4] : memref<1x1x16xf32, #tpu.memory_space<vmem>>, vector<1x1x16xf32>
    %3 = vector.shape_cast %2 : vector<1x1x16xf32> to vector<1x16xf32>
    %4 = vector.extract_strided_slice %1 {offsets = [0, 0], sizes = [2, 16], strides = [1, 1]} : vector<4x16xf32> to vector<2x16xf32>
    %5 = vector.extract_strided_slice %1 {offsets = [2, 0], sizes = [2, 16], strides = [1, 1]} : vector<4x16xf32> to vector<2x16xf32>
    %cst = arith.constant 0.000000e+00 : f32
    %6 = vector.broadcast %cst : f32 to vector<32x2xf32>
    %c0_5 = arith.constant 0 : index
    %c0_6 = arith.constant 0 : index
    %7 = vector.load %arg13[%c0_5, %c0_6] : memref<32x20xf32, #tpu.memory_space<vmem>>, vector<32x2xf32>
    tpu.vector_store %arg13[%c0_5, %c0_6], %6 {strides = array<i32>} : memref<32x20xf32, #tpu.memory_space<vmem>>, vector<32x2xf32>,
    %cst_7 = arith.constant 0.000000e+00 : f32
    %8 = vector.broadcast %cst_7 : f32 to vector<32x2xf32>
    %c0_8 = arith.constant 0 : index
    %c18 = arith.constant 18 : index
    %9 = vector.load %arg13[%c0_8, %c18] : memref<32x20xf32, #tpu.memory_space<vmem>>, vector<32x2xf32>
    tpu.vector_store %arg13[%c0_8, %c18], %8 {strides = array<i32>} : memref<32x20xf32, #tpu.memory_space<vmem>>, vector<32x2xf32>,
    %c0_9 = arith.constant 0 : index
    %c0_10 = arith.constant 0 : index
    %10 = vector.load %arg3[%c0_9, %c0_10] : memref<32x2xf32, #tpu.memory_space<vmem>>, vector<32x2xf32>
    %cst_11 = arith.constant dense<0.000000e+00> : vector<32x16xf32>
    %11 = tpu.matmul %10, %4, %cst_11 {dimension_numbers = #tpu.dot_dimension_numbers<[1], [0], [0], [1], [0, 0, 1, 1], [], []>} : vector<32x2xf32>, vector<2x16xf32>, vector<32x16xf32> -> vector<32x16xf32>
    %c0_12 = arith.constant 0 : index
    %c0_13 = arith.constant 0 : index
    %12 = vector.load %arg4[%c0_12, %c0_13] : memref<32x1xf32, #tpu.memory_space<vmem>>, vector<32x1xf32>
    %13 = vector.broadcast %12 : vector<32x1xf32> to vector<32x16xf32>
    %14 = arith.addf %11, %13 : vector<32x16xf32>
    %15 = vector.broadcast %3 : vector<1x16xf32> to vector<32x16xf32>
    %16 = arith.mulf %14, %15 : vector<32x16xf32>
    %cst_14 = arith.constant 0.000000e+00 : f32
    %17 = vector.broadcast %cst_14 : f32 to vector<32x16xf32>
    %c0_15 = arith.constant 0 : index
    %c2 = arith.constant 2 : index
    %18 = vector.load %arg13[%c0_15, %c2] : memref<32x20xf32, #tpu.memory_space<vmem>>, vector<32x16xf32>
    tpu.vector_store %arg13[%c0_15, %c2], %16 {strides = array<i32>} : memref<32x20xf32, #tpu.memory_space<vmem>>, vector<32x16xf32>,
    %cst_16 = arith.constant 0.000000e+00 : f32
    %19 = vector.broadcast %cst_16 : f32 to vector<64x16xf32>
    %c0_17 = arith.constant 0 : index
    %c0_18 = arith.constant 0 : index
    %20 = vector.load %arg13[%c0_17, %c0_18] : memref<32x20xf32, #tpu.memory_space<vmem>>, vector<32x16xf32>
    %c0_19 = arith.constant 0 : index
    %c0_20 = arith.constant 0 : index
    %c0_21 = arith.constant 0 : index
    %21 = vector.load %arg5[%c0_19, %c0_20, %c0_21] : memref<10x64x32xf32, #tpu.memory_space<vmem>>, vector<1x64x32xf32>
    %22 = vector.shape_cast %21 : vector<1x64x32xf32> to vector<64x32xf32>
    %cst_22 = arith.constant dense<0.000000e+00> : vector<64x16xf32>
    %23 = tpu.matmul %22, %20, %cst_22 {dimension_numbers = #tpu.dot_dimension_numbers<[1], [0], [0], [1], [0, 0, 1, 1], [], []>} : vector<64x32xf32>, vector<32x16xf32>, vector<64x16xf32> -> vector<64x16xf32>
    %24 = arith.addf %19, %23 : vector<64x16xf32>
    %c0_23 = arith.constant 0 : index
    %c1 = arith.constant 1 : index
    %25 = vector.load %arg13[%c0_23, %c1] : memref<32x20xf32, #tpu.memory_space<vmem>>, vector<32x16xf32>
    %c1_24 = arith.constant 1 : index
    %c0_25 = arith.constant 0 : index
    %c0_26 = arith.constant 0 : index
    %26 = vector.load %arg5[%c1_24, %c0_25, %c0_26] : memref<10x64x32xf32, #tpu.memory_space<vmem>>, vector<1x64x32xf32>
    %27 = vector.shape_cast %26 : vector<1x64x32xf32> to vector<64x32xf32>
    %cst_27 = arith.constant dense<0.000000e+00> : vector<64x16xf32>
    %28 = tpu.matmul %27, %25, %cst_27 {dimension_numbers = #tpu.dot_dimension_numbers<[1], [0], [0], [1], [0, 0, 1, 1], [], []>} : vector<64x32xf32>, vector<32x16xf32>, vector<64x16xf32> -> vector<64x16xf32>
    %29 = arith.addf %24, %28 : vector<64x16xf32>
    %c0_28 = arith.constant 0 : index
    %c2_29 = arith.constant 2 : index
    %30 = vector.load %arg13[%c0_28, %c2_29] : memref<32x20xf32, #tpu.memory_space<vmem>>, vector<32x16xf32>
    %c2_30 = arith.constant 2 : index
    %c0_31 = arith.constant 0 : index
    %c0_32 = arith.constant 0 : index
    %31 = vector.load %arg5[%c2_30, %c0_31, %c0_32] : memref<10x64x32xf32, #tpu.memory_space<vmem>>, vector<1x64x32xf32>
    %32 = vector.shape_cast %31 : vector<1x64x32xf32> to vector<64x32xf32>
    %cst_33 = arith.constant dense<0.000000e+00> : vector<64x16xf32>
    %33 = tpu.matmul %32, %30, %cst_33 {dimension_numbers = #tpu.dot_dimension_numbers<[1], [0], [0], [1], [0, 0, 1, 1], [], []>} : vector<64x32xf32>, vector<32x16xf32>, vector<64x16xf32> -> vector<64x16xf32>
    %34 = arith.addf %29, %33 : vector<64x16xf32>
    %c0_34 = arith.constant 0 : index
    %c3 = arith.constant 3 : index
    %35 = vector.load %arg13[%c0_34, %c3] : memref<32x20xf32, #tpu.memory_space<vmem>>, vector<32x16xf32>
    %c3_35 = arith.constant 3 : index
    %c0_36 = arith.constant 0 : index
    %c0_37 = arith.constant 0 : index
    %36 = vector.load %arg5[%c3_35, %c0_36, %c0_37] : memref<10x64x32xf32, #tpu.memory_space<vmem>>, vector<1x64x32xf32>
    %37 = vector.shape_cast %36 : vector<1x64x32xf32> to vector<64x32xf32>
    %cst_38 = arith.constant dense<0.000000e+00> : vector<64x16xf32>
    %38 = tpu.matmul %37, %35, %cst_38 {dimension_numbers = #tpu.dot_dimension_numbers<[1], [0], [0], [1], [0, 0, 1, 1], [], []>} : vector<64x32xf32>, vector<32x16xf32>, vector<64x16xf32> -> vector<64x16xf32>
    %39 = arith.addf %34, %38 : vector<64x16xf32>
    %c0_39 = arith.constant 0 : index
    %c4 = arith.constant 4 : index
    %40 = vector.load %arg13[%c0_39, %c4] : memref<32x20xf32, #tpu.memory_space<vmem>>, vector<32x16xf32>
    %c4_40 = arith.constant 4 : index
    %c0_41 = arith.constant 0 : index
    %c0_42 = arith.constant 0 : index
    %41 = vector.load %arg5[%c4_40, %c0_41, %c0_42] : memref<10x64x32xf32, #tpu.memory_space<vmem>>, vector<1x64x32xf32>
    %42 = vector.shape_cast %41 : vector<1x64x32xf32> to vector<64x32xf32>
    %cst_43 = arith.constant dense<0.000000e+00> : vector<64x16xf32>
    %43 = tpu.matmul %42, %40, %cst_43 {dimension_numbers = #tpu.dot_dimension_numbers<[1], [0], [0], [1], [0, 0, 1, 1], [], []>} : vector<64x32xf32>, vector<32x16xf32>, vector<64x16xf32> -> vector<64x16xf32>
    %44 = arith.addf %39, %43 : vector<64x16xf32>
    %c0_44 = arith.constant 0 : index
    %c0_45 = arith.constant 0 : index
    %c0_46 = arith.constant 0 : index
    %45 = vector.load %arg6[%c0_44, %c0_45, %c0_46] : memref<2x64x1xf32, #tpu.memory_space<vmem>>, vector<1x64x1xf32>
    %46 = vector.shape_cast %45 : vector<1x64x1xf32> to vector<64x1xf32>
    %47 = vector.broadcast %46 : vector<64x1xf32> to vector<64x16xf32>
    %48 = arith.addf %44, %47 : vector<64x16xf32>
    %49 = vector.extract_strided_slice %48 {offsets = [0, 0], sizes = [32, 16], strides = [1, 1]} : vector<64x16xf32> to vector<32x16xf32>
    %50 = math.tanh %49 : vector<32x16xf32>
    %51 = vector.extract_strided_slice %48 {offsets = [32, 0], sizes = [32, 16], strides = [1, 1]} : vector<64x16xf32> to vector<32x16xf32>
    %52 = arith.negf %51 : vector<32x16xf32>
    %53 = math.exp %52 : vector<32x16xf32>
    %cst_47 = arith.constant 1.000000e+00 : f32
    %54 = vector.broadcast %cst_47 : f32 to vector<32x16xf32>
    %55 = arith.addf %54, %53 : vector<32x16xf32>
    %56 = arith.divf %54, %55 : vector<32x16xf32>
    %57 = arith.mulf %50, %56 : vector<32x16xf32>
    %c0_48 = arith.constant 0 : index
    %c0_49 = arith.constant 0 : index
    %c0_50 = arith.constant 0 : index
    %58 = vector.load %arg7[%c0_48, %c0_49, %c0_50] : memref<2x64x32xf32, #tpu.memory_space<vmem>>, vector<1x64x32xf32>
    %59 = vector.shape_cast %58 : vector<1x64x32xf32> to vector<64x32xf32>
    %cst_51 = arith.constant dense<0.000000e+00> : vector<64x16xf32>
    %60 = tpu.matmul %59, %57, %cst_51 {dimension_numbers = #tpu.dot_dimension_numbers<[1], [0], [0], [1], [0, 0, 1, 1], [], []>} : vector<64x32xf32>, vector<32x16xf32>, vector<64x16xf32> -> vector<64x16xf32>
    %c0_52 = arith.constant 0 : index
    %c0_53 = arith.constant 0 : index
    %c0_54 = arith.constant 0 : index
    %61 = vector.load %arg8[%c0_52, %c0_53, %c0_54] : memref<2x64x1xf32, #tpu.memory_space<vmem>>, vector<1x64x1xf32>
    %62 = vector.shape_cast %61 : vector<1x64x1xf32> to vector<64x1xf32>
    %63 = vector.broadcast %62 : vector<64x1xf32> to vector<64x16xf32>
    %64 = arith.addf %60, %63 : vector<64x16xf32>
    %65 = vector.extract_strided_slice %64 {offsets = [0, 0], sizes = [32, 16], strides = [1, 1]} : vector<64x16xf32> to vector<32x16xf32>
    %66 = arith.addf %16, %65 : vector<32x16xf32>
    %67 = vector.broadcast %3 : vector<1x16xf32> to vector<32x16xf32>
    %68 = arith.mulf %66, %67 : vector<32x16xf32>
    %69 = vector.extract_strided_slice %64 {offsets = [32, 0], sizes = [32, 16], strides = [1, 1]} : vector<64x16xf32> to vector<32x16xf32>
    %70 = arith.addf %17, %69 : vector<32x16xf32>
    %c0_55 = arith.constant 0 : index
    %c2_56 = arith.constant 2 : index
    %71 = vector.load %arg13[%c0_55, %c2_56] : memref<32x20xf32, #tpu.memory_space<vmem>>, vector<32x16xf32>
    tpu.vector_store %arg13[%c0_55, %c2_56], %68 {strides = array<i32>} : memref<32x20xf32, #tpu.memory_space<vmem>>, vector<32x16xf32>,
    %cst_57 = arith.constant 0.000000e+00 : f32
    %72 = vector.broadcast %cst_57 : f32 to vector<64x16xf32>
    %c0_58 = arith.constant 0 : index
    %c0_59 = arith.constant 0 : index
    %73 = vector.load %arg13[%c0_58, %c0_59] : memref<32x20xf32, #tpu.memory_space<vmem>>, vector<32x16xf32>
    %c5 = arith.constant 5 : index
    %c0_60 = arith.constant 0 : index
    %c0_61 = arith.constant 0 : index
    %74 = vector.load %arg5[%c5, %c0_60, %c0_61] : memref<10x64x32xf32, #tpu.memory_space<vmem>>, vector<1x64x32xf32>
    %75 = vector.shape_cast %74 : vector<1x64x32xf32> to vector<64x32xf32>
    %cst_62 = arith.constant dense<0.000000e+00> : vector<64x16xf32>
    %76 = tpu.matmul %75, %73, %cst_62 {dimension_numbers = #tpu.dot_dimension_numbers<[1], [0], [0], [1], [0, 0, 1, 1], [], []>} : vector<64x32xf32>, vector<32x16xf32>, vector<64x16xf32> -> vector<64x16xf32>
    %77 = arith.addf %72, %76 : vector<64x16xf32>
    %c0_63 = arith.constant 0 : index
    %c1_64 = arith.constant 1 : index
    %78 = vector.load %arg13[%c0_63, %c1_64] : memref<32x20xf32, #tpu.memory_space<vmem>>, vector<32x16xf32>
    %c6 = arith.constant 6 : index
    %c0_65 = arith.constant 0 : index
    %c0_66 = arith.constant 0 : index
    %79 = vector.load %arg5[%c6, %c0_65, %c0_66] : memref<10x64x32xf32, #tpu.memory_space<vmem>>, vector<1x64x32xf32>
    %80 = vector.shape_cast %79 : vector<1x64x32xf32> to vector<64x32xf32>
    %cst_67 = arith.constant dense<0.000000e+00> : vector<64x16xf32>
    %81 = tpu.matmul %80, %78, %cst_67 {dimension_numbers = #tpu.dot_dimension_numbers<[1], [0], [0], [1], [0, 0, 1, 1], [], []>} : vector<64x32xf32>, vector<32x16xf32>, vector<64x16xf32> -> vector<64x16xf32>
    %82 = arith.addf %77, %81 : vector<64x16xf32>
    %c0_68 = arith.constant 0 : index
    %c2_69 = arith.constant 2 : index
    %83 = vector.load %arg13[%c0_68, %c2_69] : memref<32x20xf32, #tpu.memory_space<vmem>>, vector<32x16xf32>
    %c7 = arith.constant 7 : index
    %c0_70 = arith.constant 0 : index
    %c0_71 = arith.constant 0 : index
    %84 = vector.load %arg5[%c7, %c0_70, %c0_71] : memref<10x64x32xf32, #tpu.memory_space<vmem>>, vector<1x64x32xf32>
    %85 = vector.shape_cast %84 : vector<1x64x32xf32> to vector<64x32xf32>
    %cst_72 = arith.constant dense<0.000000e+00> : vector<64x16xf32>
    %86 = tpu.matmul %85, %83, %cst_72 {dimension_numbers = #tpu.dot_dimension_numbers<[1], [0], [0], [1], [0, 0, 1, 1], [], []>} : vector<64x32xf32>, vector<32x16xf32>, vector<64x16xf32> -> vector<64x16xf32>
    %87 = arith.addf %82, %86 : vector<64x16xf32>
    %c0_73 = arith.constant 0 : index
    %c3_74 = arith.constant 3 : index
    %88 = vector.load %arg13[%c0_73, %c3_74] : memref<32x20xf32, #tpu.memory_space<vmem>>, vector<32x16xf32>
    %c8 = arith.constant 8 : index
    %c0_75 = arith.constant 0 : index
    %c0_76 = arith.constant 0 : index
    %89 = vector.load %arg5[%c8, %c0_75, %c0_76] : memref<10x64x32xf32, #tpu.memory_space<vmem>>, vector<1x64x32xf32>
    %90 = vector.shape_cast %89 : vector<1x64x32xf32> to vector<64x32xf32>
    %cst_77 = arith.constant dense<0.000000e+00> : vector<64x16xf32>
    %91 = tpu.matmul %90, %88, %cst_77 {dimension_numbers = #tpu.dot_dimension_numbers<[1], [0], [0], [1], [0, 0, 1, 1], [], []>} : vector<64x32xf32>, vector<32x16xf32>, vector<64x16xf32> -> vector<64x16xf32>
    %92 = arith.addf %87, %91 : vector<64x16xf32>
    %c0_78 = arith.constant 0 : index
    %c4_79 = arith.constant 4 : index
    %93 = vector.load %arg13[%c0_78, %c4_79] : memref<32x20xf32, #tpu.memory_space<vmem>>, vector<32x16xf32>
    %c9 = arith.constant 9 : index
    %c0_80 = arith.constant 0 : index
    %c0_81 = arith.constant 0 : index
    %94 = vector.load %arg5[%c9, %c0_80, %c0_81] : memref<10x64x32xf32, #tpu.memory_space<vmem>>, vector<1x64x32xf32>
    %95 = vector.shape_cast %94 : vector<1x64x32xf32> to vector<64x32xf32>
    %cst_82 = arith.constant dense<0.000000e+00> : vector<64x16xf32>
    %96 = tpu.matmul %95, %93, %cst_82 {dimension_numbers = #tpu.dot_dimension_numbers<[1], [0], [0], [1], [0, 0, 1, 1], [], []>} : vector<64x32xf32>, vector<32x16xf32>, vector<64x16xf32> -> vector<64x16xf32>
    %97 = arith.addf %92, %96 : vector<64x16xf32>
    %c1_83 = arith.constant 1 : index
    %c0_84 = arith.constant 0 : index
    %c0_85 = arith.constant 0 : index
    %98 = vector.load %arg6[%c1_83, %c0_84, %c0_85] : memref<2x64x1xf32, #tpu.memory_space<vmem>>, vector<1x64x1xf32>
    %99 = vector.shape_cast %98 : vector<1x64x1xf32> to vector<64x1xf32>
    %100 = vector.broadcast %99 : vector<64x1xf32> to vector<64x16xf32>
    %101 = arith.addf %97, %100 : vector<64x16xf32>
    %102 = vector.extract_strided_slice %101 {offsets = [0, 0], sizes = [32, 16], strides = [1, 1]} : vector<64x16xf32> to vector<32x16xf32>
    %103 = math.tanh %102 : vector<32x16xf32>
    %104 = vector.extract_strided_slice %101 {offsets = [32, 0], sizes = [32, 16], strides = [1, 1]} : vector<64x16xf32> to vector<32x16xf32>
    %105 = arith.negf %104 : vector<32x16xf32>
    %106 = math.exp %105 : vector<32x16xf32>
    %cst_86 = arith.constant 1.000000e+00 : f32
    %107 = vector.broadcast %cst_86 : f32 to vector<32x16xf32>
    %108 = arith.addf %107, %106 : vector<32x16xf32>
    %109 = arith.divf %107, %108 : vector<32x16xf32>
    %110 = arith.mulf %103, %109 : vector<32x16xf32>
    %c1_87 = arith.constant 1 : index
    %c0_88 = arith.constant 0 : index
    %c0_89 = arith.constant 0 : index
    %111 = vector.load %arg7[%c1_87, %c0_88, %c0_89] : memref<2x64x32xf32, #tpu.memory_space<vmem>>, vector<1x64x32xf32>
    %112 = vector.shape_cast %111 : vector<1x64x32xf32> to vector<64x32xf32>
    %113 = vector.extract_strided_slice %112 {offsets = [0, 0], sizes = [32, 32], strides = [1, 1]} : vector<64x32xf32> to vector<32x32xf32>
    %cst_90 = arith.constant dense<0.000000e+00> : vector<32x16xf32>
    %114 = tpu.matmul %113, %110, %cst_90 {dimension_numbers = #tpu.dot_dimension_numbers<[1], [0], [0], [1], [0, 0, 1, 1], [], []>} : vector<32x32xf32>, vector<32x16xf32>, vector<32x16xf32> -> vector<32x16xf32>
    %c1_91 = arith.constant 1 : index
    %c0_92 = arith.constant 0 : index
    %c0_93 = arith.constant 0 : index
    %115 = vector.load %arg8[%c1_91, %c0_92, %c0_93] : memref<2x64x1xf32, #tpu.memory_space<vmem>>, vector<1x64x1xf32>
    %116 = vector.shape_cast %115 : vector<1x64x1xf32> to vector<64x1xf32>
    %117 = vector.extract_strided_slice %116 {offsets = [0, 0], sizes = [32, 1], strides = [1, 1]} : vector<64x1xf32> to vector<32x1xf32>
    %118 = vector.broadcast %117 : vector<32x1xf32> to vector<32x16xf32>
    %119 = arith.addf %114, %118 : vector<32x16xf32>
    %120 = arith.addf %70, %119 : vector<32x16xf32>
    %121 = vector.broadcast %3 : vector<1x16xf32> to vector<32x16xf32>
    %122 = arith.mulf %120, %121 : vector<32x16xf32>
    %c0_94 = arith.constant 0 : index
    %c0_95 = arith.constant 0 : index
    %123 = vector.load %arg9[%c0_94, %c0_95] : memref<4x32xf32, #tpu.memory_space<vmem>>, vector<4x32xf32>
    %cst_96 = arith.constant dense<0.000000e+00> : vector<4x16xf32>
    %124 = tpu.matmul %123, %122, %cst_96 {dimension_numbers = #tpu.dot_dimension_numbers<[1], [0], [0], [1], [0, 0, 1, 1], [], []>} : vector<4x32xf32>, vector<32x16xf32>, vector<4x16xf32> -> vector<4x16xf32>
    %c0_97 = arith.constant 0 : index
    %c0_98 = arith.constant 0 : index
    %125 = vector.load %arg10[%c0_97, %c0_98] : memref<4x1xf32, #tpu.memory_space<vmem>>, vector<4x1xf32>
    %126 = vector.broadcast %125 : vector<4x1xf32> to vector<4x16xf32>
    %127 = arith.addf %124, %126 : vector<4x16xf32>
    %128 = vector.broadcast %3 : vector<1x16xf32> to vector<4x16xf32>
    %129 = arith.mulf %127, %128 : vector<4x16xf32>
    %130 = vector.extract_strided_slice %129 {offsets = [0, 0], sizes = [2, 16], strides = [1, 1]} : vector<4x16xf32> to vector<2x16xf32>
    %131 = vector.extract_strided_slice %129 {offsets = [2, 0], sizes = [2, 16], strides = [1, 1]} : vector<4x16xf32> to vector<2x16xf32>
    %132 = math.exp %131 : vector<2x16xf32>
    %133 = arith.mulf %5, %132 : vector<2x16xf32>
    %134 = vector.broadcast %3 : vector<1x16xf32> to vector<2x16xf32>
    %135 = arith.mulf %133, %134 : vector<2x16xf32>
    %136 = arith.addf %130, %135 : vector<2x16xf32>
    %cst_99 = arith.constant dense<0.000000e+00> : vector<16xf32>
    %137 = vector.multi_reduction <add>, %131, %cst_99 [0] : vector<2x16xf32> to vector<16xf32>
    %138 = vector.shape_cast %137 : vector<16xf32> to vector<1x16xf32>
    %c0_100 = arith.constant 0 : index
    %c0_101 = arith.constant 0 : index
    %c0_102 = arith.constant 0 : index
    %139 = vector.load %arg12[%c0_100, %c0_101, %c0_102] : memref<1x1x16xf32, #tpu.memory_space<vmem>>, vector<1x1x16xf32>
    %140 = vector.shape_cast %139 : vector<1x1x16xf32> to vector<1x16xf32>
    %141 = vector.shape_cast %138 : vector<1x16xf32> to vector<1x1x16xf32>
    tpu.vector_store %arg12[%c0_100, %c0_101, %c0_102], %141 {strides = array<i32>} : memref<1x1x16xf32, #tpu.memory_space<vmem>>, vector<1x1x16xf32>,
    %142 = tpu.concatenate %4, %136 in 0 : vector<2x16xf32>, vector<2x16xf32> -> vector<4x16xf32>
    %c0_103 = arith.constant 0 : index
    %c0_104 = arith.constant 0 : index
    %c0_105 = arith.constant 0 : index
    %143 = vector.load %arg11[%c0_103, %c0_104, %c0_105] : memref<1x4x16xf32, #tpu.memory_space<vmem>>, vector<1x4x16xf32>
    %144 = vector.shape_cast %143 : vector<1x4x16xf32> to vector<4x16xf32>
    %145 = vector.shape_cast %142 : vector<4x16xf32> to vector<1x4x16xf32>
    tpu.vector_store %arg11[%c0_103, %c0_104, %c0_105], %145 {strides = array<i32>} : memref<1x4x16xf32, #tpu.memory_space<vmem>>, vector<1x4x16xf32>,
    return
  }
  func.func @transform_0(%arg0: i32) -> (i32, i32, i32) {
    %c0_i32 = arith.constant 0 : i32
    %c0_i32_0 = arith.constant 0 : i32
    %c0_i32_1 = arith.constant 0 : i32
    return %arg0, %c0_i32, %c0_i32_0 : i32, i32, i32
  }
  func.func @transform_1(%arg0: i32) -> (i32, i32, i32) {
    %c0_i32 = arith.constant 0 : i32
    %c0_i32_0 = arith.constant 0 : i32
    %c0_i32_1 = arith.constant 0 : i32
    return %arg0, %c0_i32, %c0_i32_0 : i32, i32, i32
  }
  func.func @transform_2(%arg0: i32) -> (i32, i32) {
    %c0_i32 = arith.constant 0 : i32
    %c0_i32_0 = arith.constant 0 : i32
    %c0_i32_1 = arith.constant 0 : i32
    return %c0_i32, %c0_i32_0 : i32, i32
  }
  func.func @transform_3(%arg0: i32) -> (i32, i32) {
    %c0_i32 = arith.constant 0 : i32
    %c0_i32_0 = arith.constant 0 : i32
    %c0_i32_1 = arith.constant 0 : i32
    return %c0_i32, %c0_i32_0 : i32, i32
  }
  func.func @transform_4(%arg0: i32) -> (i32, i32, i32) {
    %c0_i32 = arith.constant 0 : i32
    %c0_i32_0 = arith.constant 0 : i32
    %c0_i32_1 = arith.constant 0 : i32
    %c0_i32_2 = arith.constant 0 : i32
    return %c0_i32, %c0_i32_0, %c0_i32_1 : i32, i32, i32
  }
  func.func @transform_5(%arg0: i32) -> (i32, i32, i32) {
    %c0_i32 = arith.constant 0 : i32
    %c0_i32_0 = arith.constant 0 : i32
    %c0_i32_1 = arith.constant 0 : i32
    %c0_i32_2 = arith.constant 0 : i32
    return %c0_i32, %c0_i32_0, %c0_i32_1 : i32, i32, i32
  }
  func.func @transform_6(%arg0: i32) -> (i32, i32, i32) {
    %c0_i32 = arith.constant 0 : i32
    %c0_i32_0 = arith.constant 0 : i32
    %c0_i32_1 = arith.constant 0 : i32
    %c0_i32_2 = arith.constant 0 : i32
    return %c0_i32, %c0_i32_0, %c0_i32_1 : i32, i32, i32
  }
  func.func @transform_7(%arg0: i32) -> (i32, i32, i32) {
    %c0_i32 = arith.constant 0 : i32
    %c0_i32_0 = arith.constant 0 : i32
    %c0_i32_1 = arith.constant 0 : i32
    %c0_i32_2 = arith.constant 0 : i32
    return %c0_i32, %c0_i32_0, %c0_i32_1 : i32, i32, i32
  }
  func.func @transform_8(%arg0: i32) -> (i32, i32) {
    %c0_i32 = arith.constant 0 : i32
    %c0_i32_0 = arith.constant 0 : i32
    %c0_i32_1 = arith.constant 0 : i32
    return %c0_i32, %c0_i32_0 : i32, i32
  }
  func.func @transform_9(%arg0: i32) -> (i32, i32) {
    %c0_i32 = arith.constant 0 : i32
    %c0_i32_0 = arith.constant 0 : i32
    %c0_i32_1 = arith.constant 0 : i32
    return %c0_i32, %c0_i32_0 : i32, i32
  }
  func.func @transform_10(%arg0: i32) -> (i32, i32, i32) {
    %c0_i32 = arith.constant 0 : i32
    %c0_i32_0 = arith.constant 0 : i32
    %c0_i32_1 = arith.constant 0 : i32
    return %arg0, %c0_i32, %c0_i32_0 : i32, i32, i32
  }
  func.func @transform_11(%arg0: i32) -> (i32, i32, i32) {
    %c0_i32 = arith.constant 0 : i32
    %c0_i32_0 = arith.constant 0 : i32
    %c0_i32_1 = arith.constant 0 : i32
    return %arg0, %c0_i32, %c0_i32_0 : i32, i32, i32
  }
}

</mosaic_0001>

<bundles_post_ra>
// kernel: tpu_custom_call.1
= control target key start
LH: loop header
LB: loop body
LE: loop exit
PB: predicated region body
PF: predicated region fallthrough
CT: control target
= control target key end

     0   :  { %s4582_s0 = inlined_call_operand.vmem [shape: f32[2,4,16], index: 0, kind: input, shape index: {}]   ;;  %s4583_s1 = inlined_call_operand.vmem [shape: f32[2,1,16], index: 1, kind: input, shape index: {}]   ;;  %s4584_s2 = inlined_call_operand.vmem [shape: f32[32,2], index: 2, kind: input, shape index: {}]   ;;  %s4585_s3 = inlined_call_operand.vmem [shape: f32[32,1], index: 3, kind: input, shape index: {}]   ;;  %s4586_s4 = inlined_call_operand.vmem [shape: f32[10,64,32], index: 4, kind: input, shape index: {}]   ;;  %s4587_s5 = inlined_call_operand.vmem [shape: f32[2,64,1], index: 5, kind: input, shape index: {}]   ;;  %s4588_s6 = inlined_call_operand.vmem [shape: f32[2,64,32], index: 6, kind: input, shape index: {}]   ;;  %s4589_s7 = inlined_call_operand.vmem [shape: f32[2,64,1], index: 7, kind: input, shape index: {}]   ;;  %s4590_s8 = inlined_call_operand.vmem [shape: f32[4,32], index: 8, kind: input, shape index: {}]   ;;  %s4591_s9 = inlined_call_operand.vmem [shape: f32[4,1], index: 9, kind: input, shape index: {}]   ;;  %s4592_s10 = inlined_call_operand.hbm [shape: f32[2,4,16], index: 10, kind: output, shape index: {0}]   ;;  %s4593_s11 = inlined_call_operand.hbm [shape: f32[2,1,16], index: 11, kind: output, shape index: {1}]  }
   0x1   :  { %4605 = sst [smem:[#allocation11_spill]] %s4582_s0 }
   0x2   :  { %17 = vsyncpa [#allocation4], 0 }
   0x3   :  { %19 = vsyncpa [#allocation4 + $0x1], 0 }
   0x4   :  { %20 = vsyncpa [#allocation6], 0 }
   0x5   :  { %22 = vsyncpa [#allocation6 + $0x1], 0  ;;  %s3759_s17 = smov 0   ;;  %s3761_s18 = smov 0  }
   0x6   :  { %s3763_s19 = smov 0   ;;  %s3765_s20 = smov 0  }
   0x7 LB: > { %4606 = sst [smem:[#allocation9_spill]] %s3683_s19  ;;  %s3780_s21 = sadd.s32 4294967295, %s3687_s20   ;;  %s3687_s20 = sphi %s3765_s20, %s4621_s20   ;;  %s3683_s19 = sphi %s3763_s19, %s4618_s19   ;;  %s3679_s18 = sphi %s3761_s18, %s4620_s18   ;;  %s3675_s17 = sphi %s3759_s17, %s4619_s17  }
   0x8   : > { %s2882_s22 = sadd.s32 4294967294, %s3687_s20   ;;  %s3784_s23 = sadd.s32 1, %s3687_s20  }
   0x9   : > { %s255_s24 = sadd.s32 1, %s3683_s19  ;;  %s252_s25 = ssub.s32 %s3687_s20, %s3784_s23 }
   0xa   : > { %p265_p0 = scmp.ne.s32.totalorder %s3683_s19, %s3679_s18  ;;  %p253_p1 = scmp.eq.s32.totalorder %s252_s25, 0 }
   0xb   : > { %p266_p2 = scmp.eq.s32.totalorder %s3780_s21, 1  ;;  %p271_p3 = scmp.ne.s32.totalorder %s3679_s18, %s3675_s17 }
   0xc   : > { %p272_p4 = scmp.eq.s32.totalorder %s2882_s22, 1  ;;  %p2885_p7 = scmp.ge.s32.totalorder %s3687_s20, 1 }
   0xd   : > { %s3795_s26 = scalar_select %p253_p1, %s3683_s19, %s255_s24  }
   0xe   : > { %p3797_p5 = por %p266_p2, %p265_p0  ;;  %p3801_p6 = por %p272_p4, %p271_p3 }
   0xf   : > { %4607 = sst [smem:[#allocation10_spill]] %s3795_s26  ;;  %p353_p8 = scmp.lt.s32.totalorder %s3687_s20, 3 }
  0x11   : > { %p354_p9 = pnand %p2885_p7, %p353_p8 }
  0x12   : > { %p399_p10 = scmp.lt.s32.totalorder (!%p354_p9), %s3780_s21, 1  ;;  %s4610_s0 = sld [smem:[#allocation11_spill]] (!%p354_p9) }
  0x13   : > { %357 = sbr.rel (%p354_p9) target bundleno = 1955 (0x7a3), region = 60  ;;  %s4601_s30 = smov (!%p354_p9), 2  }
  0x14   : > { %s4597_s24 = smov (!%p354_p9), 127   ;;  %s4599_s14 = smov (!%p354_p9), 125  }
  0x15   : > { %s4612_s19 = smov (!%p354_p9), 127   ;;  %s4614_s26 = smov (!%p354_p9), 125  }
  0x16   : > { %s3085_s13 = sshll.u32 (!%p354_p9), %s3780_s21, 4 }
  0x18   : > { %vm408_vm0 = vcmask 15360   ;;  %v418_v0 = vld [vmem:[%s4584_s2] sm:$0xff]  ;;  %v425_v1 = vld [vmem:[%s4585_s3 + $0x18] sm:$0xff]  ;;  %v423_v2 = vld [vmem:[%s4585_s3 + $0x8] sm:$0xff]  ;;  %s3819_s16 = scalar_select %p399_p10, %s3780_s21, 1  ;;  %v3689_v3 = vmov 0  }
  0x19   : > { %3240 = vmatprep.mubr.msk.f32.mxu0 %vm408_vm0, %v418_v0  ;;  %3544 = vset.pattern.permute.xlu1 %v3689_v3  ;;  %vm458_vm1 = vcmask 1041408   ;;  %v424_v4 = vld [vmem:[%s4585_s3 + $0x10] sm:$0xff]  ;;  %v422_v5 = vld [vmem:[%s4585_s3] sm:$0xff]  ;;  %v419_v7 = vld [vmem:[%s4584_s2 + $0x8] sm:$0xff]  ;;  %vm413_vm2 = vcmask 162960   ;;  %v3690_v10 = vmov 0.0  }
  0x1a   : > { %3543 = vset.pattern.permute.xlu0 %v3689_v3  ;;  %433 = vperm.xlu1 %3544, %v423_v2   ;;  %s2887_s22 = sshll.u32 %s3819_s16, 2  ;;  %v420_v8 = vld [vmem:[%s4584_s2 + $0x10] sm:$0xff]  ;;  %v421_v9 = vld [vmem:[%s4584_s2 + $0x18] sm:$0xff]  ;;  %412 = vst.msk [vmem:[#allocation2 + $0x18] sm:$0xff] %vm408_vm0, %v3690_v10  ;;  %409 = vst.msk [vmem:[#allocation2] sm:$0xff] %vm408_vm0, %v3690_v10  ;;  %s3864_s29 = scalar_lea.vmem %s4583_s1, %s3819_s16  ;;  %vm573_vm3 = vcmask 146448  }
  0x1b   : > { %443 = vperm.xlu0 %3543, %v425_v1   ;;  %s3828_s12 = scalar_lea.vmem %s4610_s0, %s2887_s22  ;;  %410 = vst.msk [vmem:[#allocation2 + $0x8] sm:$0xff] %vm408_vm0, %v3690_v10  ;;  %411 = vst.msk [vmem:[#allocation2 + $0x10] sm:$0xff] %vm408_vm0, %v3690_v10  ;;  %v3867_v18 = vld [vmem:[%s3864_s29] ss:$0 sm:$0xff]  ;;  %vm615_vm4 = vcmask 261120   ;;  %v583_v38 = vld [vmem:[%s4586_s4 + $0x8] sm:$0xff] }
  0x1c   : > { %v406_v6 = vld [vmem:[%s3828_s12] sm:$0xf]  ;;  %417 = vst.msk [vmem:[#allocation2 + $0x18] sm:$0xff] %vm413_vm2, %v3690_v10  ;;  %416 = vst.msk [vmem:[#allocation2 + $0x10] sm:$0xff] %vm413_vm2, %v3690_v10  ;;  %v584_v39 = vld [vmem:[%s4586_s4 + $0x10] sm:$0xff]  ;;  %s4595_s16 = smov 126  }
  0x1d   : > { %3238 = vmatprep.subr.msk.mxu0 %vm458_vm1, %v406_v6  ;;  %414 = vst.msk [vmem:[#allocation2] sm:$0xff] %vm413_vm2, %v3690_v10  ;;  %415 = vst.msk [vmem:[#allocation2 + $0x8] sm:$0xff] %vm413_vm2, %v3690_v10  ;;  %v2894_v30 = vld [vmem:[%s4586_s4 + $0x40] sm:$0xff]  ;;  %v585_v40 = vld [vmem:[%s4586_s4 + $0x18] sm:$0xff]  ;;  %vm3696_vm5 = vmmov 0   ;;  %vm2739_vm6 = vcmask 123904  }
  0x1e   : > { %3239 = vmatpush3.msk.msra.mxu0 %vm458_vm1, %v406_v6  ;;  %428 = vperm.xlu1 %3544, %v422_v5   ;;  %v582_v31 = vld [vmem:[%s4586_s4] sm:$0xff]  ;;  %v587_v42 = vld [vmem:[%s4586_s4 + $0x28] sm:$0xff]  ;;  %v588_v43 = vld [vmem:[%s4586_s4 + $0x30] sm:$0xff]  ;;  %vm2747_vm7 = vcmask 122880  }
  0x1f   : > { %438 = vperm.xlu0 %3543, %v424_v4   ;;  %3241 = vmatmul.mubr.msk.f32.vlgmr.msra.gmra.mxu0 %vm408_vm0, %v419_v7  ;;  %v586_v41 = vld [vmem:[%s4586_s4 + $0x20] sm:$0xff]  ;;  %v589_v44 = vld [vmem:[%s4586_s4 + $0x38] sm:$0xff]  ;;  %v1354_v47 = vld [vmem:[%s4587_s5 + $0x30] sm:$0xff] }
  0x20   : > { %3243 = vmatprep.mubr.msk.f32.mxu0 %vm408_vm0, %v420_v8  ;;  %3254 = vmatprep.mubr.msk.f32.mxu1 %vm615_vm4, %v2894_v30  ;;  %v2934_v45 = vld [vmem:[%s4586_s4 + $0xc0] sm:$0xff]  ;;  %v1355_v46 = vld [vmem:[%s4587_s5 + $0x38] sm:$0xff]  ;;  %v1353_v48 = vld [vmem:[%s4587_s5 + $0x28] sm:$0xff] }
  0x21   : > { %v1352_v49 = vld [vmem:[%s4587_s5 + $0x20] sm:$0xff]  ;;  %v1351_v50 = vld [vmem:[%s4587_s5 + $0x18] sm:$0xff]  ;;  %v1350_v51 = vld [vmem:[%s4587_s5 + $0x10] sm:$0xff] }
  0x22   : > { %v1349_v52 = vld [vmem:[%s4587_s5 + $0x8] sm:$0xff]  ;;  %v1348_v53 = vld [vmem:[%s4587_s5] sm:$0xff]  ;;  %v1447_v54 = vld [vmem:[%s4589_s7 + $0x18] sm:$0xff] }
  0x23   : > { %3244 = vmatmul.mubr.msk.f32.gmra.mxu0 %vm408_vm0, %v421_v9  ;;  %v1446_v55 = vld [vmem:[%s4589_s7 + $0x10] sm:$0xff]  ;;  %v1445_v56 = vld [vmem:[%s4589_s7 + $0x8] sm:$0xff]  ;;  %v1444_v57 = vld [vmem:[%s4589_s7] sm:$0xff] }
  0x24   : > { %3274 = vmatprep.mubr.msk.f32.mxu0 %vm615_vm4, %v582_v31  ;;  %v2895_v62 = vld [vmem:[%s4586_s4 + $0x48] sm:$0xff]  ;;  %v2896_v63 = vld [vmem:[%s4586_s4 + $0x50] sm:$0xff]  ;;  %v2897_v2 = vld [vmem:[%s4586_s4 + $0x58] sm:$0xff] }
  0x25   : > { %v2898_v3 = vld [vmem:[%s4586_s4 + $0x60] sm:$0xff]  ;;  %v2899_v6 = vld [vmem:[%s4586_s4 + $0x68] sm:$0xff]  ;;  %v2900_v7 = vld [vmem:[%s4586_s4 + $0x70] sm:$0xff] }
  0x26   : > { %v2923_v30 = vld [vmem:[%s4586_s4 + $0xa8] sm:$0xff]  ;;  %v2937_v31 = vld [vmem:[%s4586_s4 + $0xd8] sm:$0xff] }
  0x95   : > { %v434_v12 = vpop.permute.xlu1 %433 }
  0x96   : > { %v444_v11 = vpop.permute.xlu0 %443 }
  0x99   : > { %v429_v19 = vpop.permute.xlu1 %428 }
  0x9a   : > { %v439_v16 = vpop.permute.xlu0 %438 }
  0xdf   : > { %v3242_v13 = vpop.f32.mrf.mxu0 }
  0xe0   : > { %v534_v21 = vadd.f32 %v3242_v13, %v434_v12  ;;  %v2918_v12 = vld [vmem:[%s4586_s4 + $0x80] sm:$0xff] }
  0xe1   : > { %v528_v14 = vpop.f32.mrf.mxu0 }
  0xe2   : > { %v529_v24 = vadd.f32 %v528_v14, %v429_v19  ;;  %v3878_v26 = vmul.f32 %v3867_v18, %v534_v21  ;;  %v2935_v21 = vld [vmem:[%s4586_s4 + $0xc8] sm:$0xff] }
  0xe3   : > { %v3245_v15 = vpop.f32.mrf.mxu0 }
  0xe4   : > { %v544_v17 = vadd.f32 %v3245_v15, %v444_v11  ;;  %v3883_v27 = vmul.f32 %v3867_v18, %v529_v24  ;;  %v2901_v11 = vld [vmem:[%s4586_s4 + $0x78] sm:$0xff]  ;;  %v2919_v15 = vld [vmem:[%s4586_s4 + $0x88] sm:$0xff]  ;;  %v2922_v24 = vld [vmem:[%s4586_s4 + $0xa0] sm:$0xff] }
  0xe5   : > { %v538_v20 = vpop.f32.mrf.mxu0 }
  0xe6   : > { %v3870_v22 = vmul.f32 %v3867_v18, %v544_v17  ;;  %v539_v23 = vadd.f32 %v538_v20, %v439_v16  ;;  %v2920_v17 = vld [vmem:[%s4586_s4 + $0x90] sm:$0xff]  ;;  %v2921_v20 = vld [vmem:[%s4586_s4 + $0x98] sm:$0xff] }
  0xe8   : > { %v3873_v25 = vmul.f32 %v3867_v18, %v539_v23  ;;  %567 = vrot.lane.b32.xlu0 %v3870_v22, %s4601_s30 }
  0xea   : > { %565 = vrot.lane.b32.xlu1 %v3873_v25, %s4601_s30 }
  0xec   : > { %563 = vrot.lane.b32.xlu0 %v3878_v26, %s4601_s30 }
  0xee   : > { %561 = vrot.lane.b32.xlu1 %v3883_v27, %s4601_s30  ;;  %s4504_s30 = sand.u32 1, %s3679_s18  }
  0xef   : > { %s398_s15 = scalar_lea.vmem [#allocation5], %s4504_s30 }
  0xf0   : > { %s2786_s22 = sshll.u32 %s398_s15, 4  ;;  %s4513_s22 = int_to_ptr.vmem [resolvable:$true] %s2786_s22 }
 0x15a   : > { %v568_v28 = vpop.permute.xlu0 %567 }
 0x15b   : > { %577 = vst.msk [vmem:[#allocation2 + $0x18] sm:$0xff] %vm573_vm3, %v568_v28  ;;  %v2936_v28 = vld [vmem:[%s4586_s4 + $0xd0] sm:$0xff] }
 0x15c   : > { %v566_v29 = vpop.permute.xlu1 %565 }
 0x15d   : > { %576 = vst.msk [vmem:[#allocation2 + $0x10] sm:$0xff] %vm573_vm3, %v566_v29 }
 0x15e   : > { %v564_v32 = vpop.permute.xlu0 %563 }
 0x15f   : > { %575 = vst.msk [vmem:[#allocation2 + $0x8] sm:$0xff] %vm573_vm3, %v564_v32  ;;  %v2924_v32 = vld [vmem:[%s4586_s4 + $0xb0] sm:$0xff] }
 0x160   : > { %v562_v33 = vpop.permute.xlu1 %561 }
 0x161   : > { %574 = vst.msk [vmem:[#allocation2] sm:$0xff] %vm573_vm3, %v562_v33  ;;  %v2938_v33 = vld [vmem:[%s4586_s4 + $0xe0] sm:$0xff] }
 0x162   : > { %v581_v34 = vld [vmem:[#allocation2 + $0x18] sm:$0xff] }
 0x163   : > { %609 = vrot.lane.b32.xlu0 %v581_v34, %s4597_s24  ;;  %3266 = vmatprep.subr.mxu0 %v581_v34 }
 0x164   : > { %3267 = vmatpush3.msra.mxu0 %v581_v34  ;;  %v580_v35 = vld [vmem:[#allocation2 + $0x10] sm:$0xff] }
 0x165   : > { %3268 = vmatprep.subr.mxu0 %v580_v35  ;;  %607 = vrot.lane.b32.xlu1 %v580_v35, %s4597_s24 }
 0x166   : > { %3269 = vmatpush3.msra.mxu0 %v580_v35  ;;  %v579_v36 = vld [vmem:[#allocation2 + $0x8] sm:$0xff] }
 0x167   : > { %605 = vrot.lane.b32.xlu0 %v579_v36, %s4597_s24  ;;  %3270 = vmatprep.subr.mxu0 %v579_v36 }
 0x168   : > { %3271 = vmatpush3.msra.mxu0 %v579_v36  ;;  %v578_v37 = vld [vmem:[#allocation2] sm:$0xff] }
 0x169   : > { %603 = vrot.lane.b32.xlu1 %v578_v37, %s4597_s24  ;;  %3272 = vmatprep.subr.mxu0 %v578_v37  ;;  %s2761_s24 = scalar_lea.sflag [#allocation6], %s4504_s30 }
 0x16a   : > { %3273 = vmatpush3.msra.mxu0 %v578_v37 }
 0x16b   : > { %889 = vrot.lane.b32.xlu0 %v581_v34, %s4595_s16  ;;  %3275 = vmatmul.mubr.msk.f32.vlgmr.msra.gmra.mxu0 %vm615_vm4, %v583_v38  ;;  %v2941_v38 = vld [vmem:[%s4586_s4 + $0xf8] sm:$0xff] }
 0x16c   : > { %3277 = vmatprep.mubr.msk.f32.mxu0 %vm615_vm4, %v584_v39  ;;  %v2951_v39 = vld [vmem:[%s4586_s4 + $0x108] sm:$0xff] }
 0x16d   : > { %887 = vrot.lane.b32.xlu1 %v580_v35, %s4595_s16 }
 0x16f   : > { %885 = vrot.lane.b32.xlu0 %v579_v36, %s4595_s16  ;;  %3278 = vmatmul.mubr.msk.f32.gmra.mxu0 %vm615_vm4, %v585_v40  ;;  %v2952_v40 = vld [vmem:[%s4586_s4 + $0x110] sm:$0xff] }
 0x170   : > { %3280 = vmatprep.mubr.msk.f32.mxu0 %vm615_vm4, %v586_v41  ;;  %v2953_v41 = vld [vmem:[%s4586_s4 + $0x118] sm:$0xff] }
 0x171   : > { %883 = vrot.lane.b32.xlu1 %v578_v37, %s4595_s16  ;;  %s4603_s16 = smov 124  }
 0x173   : > { %1047 = vrot.lane.b32.xlu0 %v581_v34, %s4599_s14  ;;  %3281 = vmatmul.mubr.msk.f32.gmra.mxu0 %vm615_vm4, %v587_v42  ;;  %v2954_v42 = vld [vmem:[%s4586_s4 + $0x120] sm:$0xff] }
 0x174   : > { %3283 = vmatprep.mubr.msk.f32.mxu0 %vm615_vm4, %v588_v43  ;;  %v2955_v43 = vld [vmem:[%s4586_s4 + $0x128] sm:$0xff] }
 0x175   : > { %1043 = vrot.lane.b32.xlu1 %v579_v36, %s4599_s14 }
 0x177   : > { %1205 = vrot.lane.b32.xlu0 %v581_v34, %s4603_s16  ;;  %3284 = vmatmul.mubr.msk.f32.gmra.mxu0 %vm615_vm4, %v589_v44  ;;  %v2925_v34 = vld [vmem:[%s4586_s4 + $0xb8] sm:$0xff]  ;;  %v2956_v44 = vld [vmem:[%s4586_s4 + $0x130] sm:$0xff] }
 0x178   : > { %3314 = vmatprep.mubr.msk.f32.mxu0 %vm615_vm4, %v2934_v45  ;;  %v2957_v45 = vld [vmem:[%s4586_s4 + $0x138] sm:$0xff] }
 0x179   : > { %1045 = vrot.lane.b32.xlu1 %v580_v35, %s4599_s14 }
 0x17b   : > { %1203 = vrot.lane.b32.xlu0 %v580_v35, %s4603_s16  ;;  %v2939_v35 = vld [vmem:[%s4586_s4 + $0xe8] sm:$0xff] }
 0x17d   : > { %1041 = vrot.lane.b32.xlu1 %v578_v37, %s4599_s14  ;;  %s3597_s14 = scalar_lea.vmem %s4513_s22, 16 }
 0x17e   : > { %p3598_p11 = scmp.ne.s32.totalorder %s4513_s22, %s3597_s14 }
 0x17f   : > { %1201 = vrot.lane.b32.xlu0 %v579_v36, %s4603_s16  ;;  %v2940_v36 = vld [vmem:[%s4586_s4 + $0xf0] sm:$0xff] }
 0x180   : > { %p3599_p12 = pnand %p3598_p11, %p3797_p5 }
 0x181   : > { %1199 = vrot.lane.b32.xlu1 %v578_v37, %s4603_s16  ;;  %v2950_v37 = vld [vmem:[%s4586_s4 + $0x100] sm:$0xff]  ;;  %s4611_s16 = smov 2  }
 0x182   : > { %p3600_p13 = pneg %p3599_p12 }
 0x183   : > { %1393 = vperm.xlu0 %3543, %v1355_v46   ;;  %v1436_v46 = vld [vmem:[%s4588_s6] sm:$0xff] }
 0x185   : > { %1388 = vperm.xlu1 %3544, %v1354_v47  }
 0x187   : > { %1383 = vperm.xlu0 %3543, %v1353_v48  }
 0x189   : > { %1378 = vperm.xlu1 %3544, %v1352_v49  }
 0x18b   : > { %1373 = vperm.xlu0 %3543, %v1351_v50  }
 0x18d   : > { %1368 = vperm.xlu1 %3544, %v1350_v51  }
 0x18f   : > { %1363 = vperm.xlu0 %3543, %v1349_v52  }
 0x191   : > { %1358 = vperm.xlu1 %3544, %v1348_v53  }
 0x193   : > { %1469 = vperm.xlu0 %3543, %v1447_v54  }
 0x195   : > { %1464 = vperm.xlu1 %3544, %v1446_v55  }
 0x197   : > { %1459 = vperm.xlu0 %3543, %v1445_v56  }
 0x199   : > { %1454 = vperm.xlu1 %3544, %v1444_v57  }
 0x1d5   : > { %v610_v58 = vpop.permute.xlu0 %609 }
 0x1d6   : > { %3246 = vmatprep.subr.mxu1 %v610_v58 }
 0x1d7   : > { %3247 = vmatpush3.msra.mxu1 %v610_v58  ;;  %v608_v59 = vpop.permute.xlu1 %607 }
 0x1d8   : > { %3248 = vmatprep.subr.mxu1 %v608_v59 }
 0x1d9   : > { %v606_v60 = vpop.permute.xlu0 %605  ;;  %3249 = vmatpush3.msra.mxu1 %v608_v59 }
 0x1da   : > { %3250 = vmatprep.subr.mxu1 %v606_v60 }
 0x1db   : > { %3251 = vmatpush3.msra.mxu1 %v606_v60  ;;  %v604_v61 = vpop.permute.xlu1 %603 }
 0x1dc   : > { %3252 = vmatprep.subr.mxu1 %v604_v61 }
 0x1dd   : > { %v890_v0 = vpop.permute.xlu0 %889  ;;  %3253 = vmatpush3.msra.mxu1 %v604_v61 }
 0x1de   : > { %3255 = vmatmul.mubr.msk.f32.vlgmr.msra.gmra.mxu1 %vm615_vm4, %v2895_v62  ;;  %3286 = vmatprep.subr.mxu1 %v890_v0 }
 0x1df   : > { %3287 = vmatpush3.msra.mxu1 %v890_v0  ;;  %v888_v1 = vpop.permute.xlu1 %887  ;;  %3257 = vmatprep.mubr.msk.f32.mxu1 %vm615_vm4, %v2896_v63 }
 0x1e0   : > { %3288 = vmatprep.subr.mxu1 %v888_v1 }
 0x1e1   : > { %v886_v4 = vpop.permute.xlu0 %885  ;;  %3289 = vmatpush3.msra.mxu1 %v888_v1 }
 0x1e2   : > { %3258 = vmatmul.mubr.msk.f32.gmra.mxu1 %vm615_vm4, %v2897_v2  ;;  %3290 = vmatprep.subr.mxu1 %v886_v4 }
 0x1e3   : > { %3291 = vmatpush3.msra.mxu1 %v886_v4  ;;  %v884_v5 = vpop.permute.xlu1 %883  ;;  %3260 = vmatprep.mubr.msk.f32.mxu1 %vm615_vm4, %v2898_v3 }
 0x1e4   : > { %3292 = vmatprep.subr.mxu1 %v884_v5 }
 0x1e5   : > { %v1048_v8 = vpop.permute.xlu0 %1047  ;;  %3293 = vmatpush3.msra.mxu1 %v884_v5 }
 0x1e6   : > { %3261 = vmatmul.mubr.msk.f32.gmra.mxu1 %vm615_vm4, %v2899_v6  ;;  %3306 = vmatprep.subr.mxu0 %v1048_v8 }
 0x1e7   : > { %3307 = vmatpush3.msra.mxu0 %v1048_v8  ;;  %v1044_v9 = vpop.permute.xlu1 %1043  ;;  %3263 = vmatprep.mubr.msk.f32.mxu1 %vm615_vm4, %v2900_v7 }
 0x1e9   : > { %v1206_v13 = vpop.permute.xlu0 %1205 }
 0x1ea   : > { %3264 = vmatmul.mubr.msk.f32.gmra.mxu1 %vm615_vm4, %v2901_v11  ;;  %3326 = vmatprep.subr.mxu1 %v1206_v13 }
 0x1eb   : > { %v1046_v14 = vpop.permute.xlu1 %1045  ;;  %3294 = vmatprep.mubr.msk.f32.mxu1 %vm615_vm4, %v2918_v12 }
 0x1ec   : > { %3308 = vmatprep.subr.mxu0 %v1046_v14 }
 0x1ed   : > { %v1204_v16 = vpop.permute.xlu0 %1203  ;;  %3309 = vmatpush3.msra.mxu0 %v1046_v14 }
 0x1ee   : > { %3295 = vmatmul.mubr.msk.f32.vlgmr.msra.gmra.mxu1 %vm615_vm4, %v2919_v15  ;;  %3310 = vmatprep.subr.mxu0 %v1044_v9 }
 0x1ef   : > { %3327 = vmatpush3.msra.mxu1 %v1206_v13  ;;  %3311 = vmatpush3.msra.mxu0 %v1044_v9  ;;  %v1042_v19 = vpop.permute.xlu1 %1041 }
 0x1f0   : > { %3328 = vmatprep.subr.mxu1 %v1204_v16  ;;  %3312 = vmatprep.subr.mxu0 %v1042_v19 }
 0x1f1   : > { %3329 = vmatpush3.msra.mxu1 %v1204_v16  ;;  %v1202_v23 = vpop.permute.xlu0 %1201  ;;  %3297 = vmatprep.mubr.msk.f32.mxu1 %vm615_vm4, %v2920_v17 }
 0x1f2   : > { %3313 = vmatpush3.msra.mxu0 %v1042_v19  ;;  %3298 = vmatmul.mubr.msk.f32.gmra.mxu1 %vm615_vm4, %v2921_v20 }
 0x1f3   : > { %3315 = vmatmul.mubr.msk.f32.vlgmr.msra.gmra.mxu0 %vm615_vm4, %v2935_v21  ;;  %3330 = vmatprep.subr.mxu1 %v1202_v23  ;;  %v1200_v29 = vpop.permute.xlu1 %1199 }
 0x1f4   : > { %3331 = vmatpush3.msra.mxu1 %v1202_v23  ;;  %3300 = vmatprep.mubr.msk.f32.mxu1 %vm615_vm4, %v2922_v24 }
 0x1f5   : > { %3332 = vmatprep.subr.mxu1 %v1200_v29  ;;  %3317 = vmatprep.mubr.msk.f32.mxu0 %vm615_vm4, %v2936_v28 }
 0x1f6   : > { %3333 = vmatpush3.msra.mxu1 %v1200_v29 }
 0x1f7   : > { %3301 = vmatmul.mubr.msk.f32.gmra.mxu1 %vm615_vm4, %v2923_v30  ;;  %3318 = vmatmul.mubr.msk.f32.gmra.mxu0 %vm615_vm4, %v2937_v31 }
 0x1f8   : > { %3303 = vmatprep.mubr.msk.f32.mxu1 %vm615_vm4, %v2924_v32  ;;  %3320 = vmatprep.mubr.msk.f32.mxu0 %vm615_vm4, %v2938_v33 }
 0x1fb   : > { %3304 = vmatmul.mubr.msk.f32.gmra.mxu1 %vm615_vm4, %v2925_v34  ;;  %3321 = vmatmul.mubr.msk.f32.gmra.mxu0 %vm615_vm4, %v2939_v35 }
 0x1fc   : > { %3323 = vmatprep.mubr.msk.f32.mxu0 %vm615_vm4, %v2940_v36  ;;  %3334 = vmatprep.mubr.msk.f32.mxu1 %vm615_vm4, %v2950_v37 }
 0x1fe   : > { %v1394_v16 = vpop.permute.xlu0 %1393 }
 0x1ff   : > { %3324 = vmatmul.mubr.msk.f32.gmra.mxu0 %vm615_vm4, %v2941_v38  ;;  %3335 = vmatmul.mubr.msk.f32.vlgmr.msra.gmra.mxu1 %vm615_vm4, %v2951_v39 }
 0x200   : > { %3337 = vmatprep.mubr.msk.f32.mxu1 %vm615_vm4, %v2952_v40  ;;  %3354 = vmatprep.mubr.msk.f32.mxu0 %vm615_vm4, %v1436_v46  ;;  %v1389_v20 = vpop.permute.xlu1 %1388 }
 0x202   : > { %v1384_v33 = vpop.permute.xlu0 %1383 }
 0x203   : > { %3338 = vmatmul.mubr.msk.f32.gmra.mxu1 %vm615_vm4, %v2953_v41 }
 0x204   : > { %3340 = vmatprep.mubr.msk.f32.mxu1 %vm615_vm4, %v2954_v42 }
 0x207   : > { %3341 = vmatmul.mubr.msk.f32.gmra.mxu1 %vm615_vm4, %v2955_v43 }
 0x208   : > { %3343 = vmatprep.mubr.msk.f32.mxu1 %vm615_vm4, %v2956_v44  ;;  %v1379_v44 = vpop.permute.xlu1 %1378 }
 0x20b   : > { %3344 = vmatmul.mubr.msk.f32.gmra.mxu1 %vm615_vm4, %v2957_v45 }
 0x22b   : > { %v4109_v47 = vpop.f32.mrf.mxu0 }
 0x22d   : > { %v4111_v48 = vpop.f32.mrf.mxu0 }
 0x22f   : > { %v4113_v49 = vpop.f32.mrf.mxu0 }
 0x231   : > { %v4119_v52 = vpop.f32.mrf.mxu0 }
 0x233   : > { %v3282_v55 = vpop.f32.mrf.mxu0 }
 0x235   : > { %v855_v58 = vpop.f32.mrf.mxu0 }
 0x237   : > { %v3285_v61 = vpop.f32.mrf.mxu0 }
 0x239   : > { %v865_v0 = vpop.f32.mrf.mxu0 }
 0x29e   : > { %v4115_v50 = vpop.f32.mrf.mxu1 }
 0x2a0   : > { %v4117_v51 = vpop.f32.mrf.mxu1 }
 0x2a2   : > { %v4121_v53 = vpop.f32.mrf.mxu1 }
 0x2a4   : > { %v4123_v54 = vpop.f32.mrf.mxu1 }
 0x2a6   : > { %v3262_v56 = vpop.f32.mrf.mxu1 }
 0x2a7   : > { %v861_v17 = vadd.f32 %v3282_v55, %v3262_v56 }
 0x2a8   : > { %v726_v57 = vpop.f32.mrf.mxu1 }
 0x2a9   : > { %v856_v21 = vadd.f32 %v855_v58, %v726_v57 }
 0x2aa   : > { %v3265_v59 = vpop.f32.mrf.mxu1 }
 0x2ab   : > { %v871_v29 = vadd.f32 %v3285_v61, %v3265_v59 }
 0x2ac   : > { %v736_v60 = vpop.f32.mrf.mxu1 }
 0x2ad   : > { %v866_v34 = vadd.f32 %v865_v0, %v736_v60 }
 0x2ae   : > { %v4125_v62 = vpop.f32.mrf.mxu1 }
 0x2b0   : > { %v4127_v63 = vpop.f32.mrf.mxu1 }
 0x2b2   : > { %v3299_v1 = vpop.f32.mrf.mxu1 }
 0x2b3   : > { %v4129_v2 = vpop.f32.mrf.mxu0 }
 0x2b4   : > { %v995_v3 = vpop.f32.mrf.mxu1 }
 0x2b5   : > { %v4131_v4 = vpop.f32.mrf.mxu0 }
 0x2b7   : > { %v3302_v5 = vpop.f32.mrf.mxu1  ;;  %v3319_v6 = vpop.f32.mrf.mxu0 }
 0x2b8   : > { %v1029_v23 = vadd.f32 %v3302_v5, %v861_v17 }
 0x2b9   : > { %v1005_v7 = vpop.f32.mrf.mxu1  ;;  %v1153_v8 = vpop.f32.mrf.mxu0 }
 0x2ba   : > { %v1028_v30 = vadd.f32 %v1005_v7, %v856_v21  ;;  %v851_v7 = vadd.f32 %v4113_v49, %v4121_v53  ;;  %v836_v49 = vadd.f32 %v4111_v48, %v4117_v51 }
 0x2bb   : > { %v3305_v9 = vpop.f32.mrf.mxu1  ;;  %v3322_v11 = vpop.f32.mrf.mxu0 }
 0x2bc   : > { %v1187_v31 = vadd.f32 %v3322_v11, %v1029_v23  ;;  %v1031_v35 = vadd.f32 %v3305_v9, %v871_v29  ;;  %v846_v11 = vadd.f32 %v4119_v52, %v4123_v54  ;;  %v1374_v29 = vpop.permute.xlu0 %1373  ;;  %v1369_v52 = vpop.permute.xlu1 %1368  ;;  %v1024_v54 = vadd.f32 %v4127_v63, %v836_v49 }
 0x2bd   : > { %v1015_v12 = vpop.f32.mrf.mxu1  ;;  %v1163_v14 = vpop.f32.mrf.mxu0 }
 0x2be   : > { %v1186_v36 = vadd.f32 %v1163_v14, %v1028_v30  ;;  %v1030_v40 = vadd.f32 %v1015_v12, %v866_v34  ;;  %v1027_v12 = vadd.f32 %v3299_v1, %v851_v7  ;;  %v1026_v14 = vadd.f32 %v995_v3, %v846_v11 }
 0x2bf   : > { %v3336_v13 = vpop.f32.mrf.mxu1  ;;  %v3325_v24 = vpop.f32.mrf.mxu0 }
 0x2c0   : > { %v1189_v41 = vadd.f32 %v3325_v24, %v1031_v35  ;;  %v1185_v17 = vadd.f32 %v3319_v6, %v1027_v12  ;;  %v1184_v21 = vadd.f32 %v1153_v8, %v1026_v14  ;;  %v1359_v63 = vpop.permute.xlu1 %1358 }
 0x2c1   : > { %v4133_v15 = vpop.f32.mrf.mxu1  ;;  %v1173_v38 = vpop.f32.mrf.mxu0 }
 0x2c2   : > { %v1188_v46 = vadd.f32 %v1173_v38, %v1030_v40 }
 0x2c3   : > { %v3339_v19 = vpop.f32.mrf.mxu1 }
 0x2c4   : > { %v1343_v23 = vadd.f32 %v3339_v19, %v1185_v17 }
 0x2c5   : > { %v1311_v28 = vpop.f32.mrf.mxu1 }
 0x2c6   : > { %v1342_v24 = vadd.f32 %v1311_v28, %v1184_v21  ;;  %v1399_v1 = vadd.f32 %v1374_v29, %v1343_v23 }
 0x2c7   : > { %v3342_v32 = vpop.f32.mrf.mxu1 }
 0x2c8   : > { %v1345_v37 = vadd.f32 %v3342_v32, %v1187_v31  ;;  %v1398_v6 = vadd.f32 %v1369_v52, %v1342_v24 }
 0x2c9   : > { %v1321_v39 = vpop.f32.mrf.mxu1 }
 0x2ca   : > { %v1401_v42 = vadd.f32 %v1384_v33, %v1345_v37  ;;  %v1344_v43 = vadd.f32 %v1321_v39, %v1186_v36 }
 0x2cb   : > { %v3345_v45 = vpop.f32.mrf.mxu1 }
 0x2cc   : > { %v2967_v55 = vmul.f32 -1.442695, %v1401_v42  ;;  %v1400_v56 = vadd.f32 %v1379_v44, %v1344_v43  ;;  %v1347_v57 = vadd.f32 %v3345_v45, %v1189_v41  ;;  %v1437_v43 = vld [vmem:[%s4588_s6 + $0x8] sm:$0xff]  ;;  %v1438_v44 = vld [vmem:[%s4588_s6 + $0x10] sm:$0xff]  ;;  %v1439_v45 = vld [vmem:[%s4588_s6 + $0x18] sm:$0xff] }
 0x2cd   : > { %v1331_v58 = vpop.f32.mrf.mxu1 }
 0x2ce   : > { %v2966_v59 = vmul.f32 -1.442695, %v1400_v56  ;;  %v1403_v61 = vadd.f32 %v1394_v16, %v1347_v57  ;;  %v1346_v5 = vadd.f32 %v1331_v58, %v1188_v46  ;;  %3545 = vpow2.f32 %v2967_v55  ;;  %v1440_v46 = vld [vmem:[%s4588_s6 + $0x20] sm:$0xff]  ;;  %v1441_v55 = vld [vmem:[%s4588_s6 + $0x28] sm:$0xff]  ;;  %v1442_v56 = vld [vmem:[%s4588_s6 + $0x30] sm:$0xff] }
 0x2cf   : > { %v841_v16 = vadd.f32 %v4109_v47, %v4115_v50  ;;  %v1182_v47 = vadd.f32 %v4131_v4, %v1024_v54  ;;  %v1443_v57 = vld [vmem:[%s4588_s6 + $0x38] sm:$0xff] }
 0x2d0   : > { %v2969_v60 = vmul.f32 -1.442695, %v1403_v61  ;;  %v1402_v0 = vadd.f32 %v1389_v20, %v1346_v5  ;;  %3547 = vpow2.f32 %v2966_v59  ;;  %v1465_v59 = vpop.permute.xlu1 %1464 }
 0x2d1   : > { %v1025_v20 = vadd.f32 %v4125_v62, %v841_v16  ;;  %v1364_v62 = vpop.permute.xlu0 %1363  ;;  %v1340_v19 = vadd.f32 %v4133_v15, %v1182_v47  ;;  %v2981_v47 = vld [vmem:[%s4586_s4 + $0x158] sm:$0xff] }
 0x2d2   : > { %3549 = vpow2.f32 %v2969_v60  ;;  %v2968_v9 = vmul.f32 -1.442695, %v1402_v0 }
 0x2d3   : > { %v1183_v53 = vadd.f32 %v4129_v2, %v1025_v20 }
 0x2d4   : > { %3551 = vpow2.f32 %v2968_v9  ;;  %v1455_v11 = vpop.permute.xlu1 %1454 }
 0x2d5   : > { %v1341_v3 = vadd.f32 %v3336_v13, %v1183_v53  ;;  %3553 = vtanh.f32 %v1399_v1  ;;  %v1396_v13 = vadd.f32 %v1359_v63, %v1340_v19  ;;  %v1470_v58 = vpop.permute.xlu0 %1469  ;;  %v2978_v53 = vld [vmem:[%s4586_s4 + $0x140] sm:$0xff]  ;;  %v2985_v19 = vld [vmem:[%s4586_s4 + $0x178] sm:$0xff] }
 0x2d6   : > { %3555 = vtanh.f32 %v1398_v6  ;;  %v2979_v6 = vld [vmem:[%s4586_s4 + $0x148] sm:$0xff]  ;;  %v3061_v63 = vld [vmem:[%s4587_s5 + $0x58] sm:$0xff] }
 0x2d7   : > { %v1397_v51 = vadd.f32 %v1364_v62, %v1341_v3  ;;  %v2984_v62 = vld [vmem:[%s4586_s4 + $0x170] sm:$0xff] }
 0x2d9   : > { %v1460_v60 = vpop.permute.xlu0 %1459 }
 0x2db   : > { %v3546_v30 = vpop.eup %3545 }
 0x2dc   : > { %v1421_v8 = vadd.f32 1.0, %v3546_v30 }
 0x2dd   : > { %v3548_v31 = vpop.eup %3547 }
 0x2de   : > { %v1420_v2 = vadd.f32 1.0, %v3548_v31  ;;  %v2980_v31 = vld [vmem:[%s4586_s4 + $0x150] sm:$0xff] }
 0x2df   : > { %v3550_v50 = vpop.eup %3549 }
 0x2e0   : > { %v1423_v28 = vadd.f32 1.0, %v3550_v50  ;;  %v2982_v50 = vld [vmem:[%s4586_s4 + $0x160] sm:$0xff] }
 0x2e1   : > { %v3552_v48 = vpop.eup %3551 }
 0x2e2   : > { %3557 = vrcp.f32 %v1423_v28  ;;  %v1422_v32 = vadd.f32 1.0, %v3552_v48  ;;  %v3554_v4 = vpop.eup %3553  ;;  %v3026_v28 = vld [vmem:[%s4586_s4 + $0x200] sm:$0xff]  ;;  %v3065_v48 = vld [vmem:[%s4587_s5 + $0x78] sm:$0xff] }
 0x2e3   : > { %3559 = vrcp.f32 %v1421_v8  ;;  %v3556_v33 = vpop.eup %3555  ;;  %v2983_v8 = vld [vmem:[%s4586_s4 + $0x168] sm:$0xff] }
 0x2e4   : > { %3561 = vrcp.f32 %v1422_v32  ;;  %v3062_v32 = vld [vmem:[%s4587_s5 + $0x60] sm:$0xff] }
 0x2e5   : > { %3563 = vtanh.f32 %v1397_v51  ;;  %v3064_v51 = vld [vmem:[%s4587_s5 + $0x70] sm:$0xff] }
 0x2e6   : > { %3565 = vrcp.f32 %v1420_v2  ;;  %v3063_v2 = vld [vmem:[%s4587_s5 + $0x68] sm:$0xff] }
 0x2e7   : > { %3567 = vtanh.f32 %v1396_v13  ;;  %v3060_v13 = vld [vmem:[%s4587_s5 + $0x50] sm:$0xff] }
 0x2ef   : > { %v3558_v34 = vpop.eup %3557 }
 0x2f0   : > { %v3560_v35 = vpop.eup %3559  ;;  %v1435_v15 = vmul.f32 %v3558_v34, %v3554_v4  ;;  %v3059_v4 = vld [vmem:[%s4587_s5 + $0x48] sm:$0xff]  ;;  %v1451_v34 = vld [vmem:[%s4589_s7 + $0x38] sm:$0xff] }
 0x2f1   : > { %v3562_v36 = vpop.eup %3561 }
 0x2f2   : > { %v3564_v37 = vpop.eup %3563  ;;  %3346 = vmatprep.subr.mxu0 %v1435_v15  ;;  %v1434_v38 = vmul.f32 %v3562_v36, %v3556_v33  ;;  %v3058_v33 = vld [vmem:[%s4587_s5 + $0x40] sm:$0xff]  ;;  %v3076_v36 = vld [vmem:[%s4589_s7 + $0x50] sm:$0xff] }
 0x2f3   : > { %v3566_v39 = vpop.eup %3565  ;;  %3347 = vmatpush3.msra.mxu0 %v1435_v15  ;;  %v1433_v40 = vmul.f32 %v3564_v37, %v3560_v35  ;;  %v3077_v35 = vld [vmem:[%s4589_s7 + $0x58] sm:$0xff]  ;;  %v1450_v15 = vld [vmem:[%s4589_s7 + $0x30] sm:$0xff]  ;;  %v1449_v37 = vld [vmem:[%s4589_s7 + $0x28] sm:$0xff] }
 0x2f4   : > { %3348 = vmatprep.subr.mxu0 %v1434_v38  ;;  %v3568_v41 = vpop.eup %3567 }
 0x2f5   : > { %3349 = vmatpush3.msra.mxu0 %v1434_v38  ;;  %v1432_v42 = vmul.f32 %v3568_v41, %v3566_v39  ;;  %v3075_v38 = vld [vmem:[%s4589_s7 + $0x48] sm:$0xff]  ;;  %v1448_v39 = vld [vmem:[%s4589_s7 + $0x20] sm:$0xff] }
 0x2f6   : > { %3350 = vmatprep.subr.mxu0 %v1433_v40  ;;  %v2648_v41 = vld [vmem:[%s4591_s9] sm:$0xf] }
 0x2f7   : > { %3351 = vmatpush3.msra.mxu0 %v1433_v40  ;;  %v3074_v40 = vld [vmem:[%s4589_s7 + $0x40] sm:$0xff] }
 0x2f8   : > { %3352 = vmatprep.subr.mxu0 %v1432_v42 }
 0x2f9   : > { %3353 = vmatpush3.msra.mxu0 %v1432_v42 }
 0x2fa   : > { %3355 = vmatmul.mubr.msk.f32.vlgmr.msra.gmra.mxu0 %vm615_vm4, %v1437_v43 }
 0x2fb   : > { %3357 = vmatprep.mubr.msk.f32.mxu0 %vm615_vm4, %v1438_v44 }
 0x2fe   : > { %3358 = vmatmul.mubr.msk.f32.gmra.mxu0 %vm615_vm4, %v1439_v45 }
 0x2ff   : > { %3360 = vmatprep.mubr.msk.f32.mxu0 %vm615_vm4, %v1440_v46  ;;  %v2987_v46 = vld [vmem:[%s4586_s4 + $0x188] sm:$0xff] }
 0x302   : > { %3361 = vmatmul.mubr.msk.f32.gmra.mxu0 %vm615_vm4, %v1441_v55  ;;  %v2988_v55 = vld [vmem:[%s4586_s4 + $0x190] sm:$0xff] }
 0x303   : > { %3363 = vmatprep.mubr.msk.f32.mxu0 %vm615_vm4, %v1442_v56 }
 0x306   : > { %3364 = vmatmul.mubr.msk.f32.gmra.mxu0 %vm615_vm4, %v1443_v57 }
 0x307   : > { %3394 = vmatprep.mubr.msk.f32.mxu0 %vm615_vm4, %v2978_v53  ;;  %v3029_v53 = vld [vmem:[%s4586_s4 + $0x218] sm:$0xff] }
 0x3ba   : > { %v3356_v61 = vpop.f32.mrf.mxu0 }
 0x3bb   : > { %v1588_v7 = vadd.f32 %v3356_v61, %v1460_v60  ;;  %v2991_v60 = vld [vmem:[%s4586_s4 + $0x1a8] sm:$0xff] }
 0x3bc   : > { %v1582_v5 = vpop.f32.mrf.mxu0 }
 0x3bd   : > { %v1583_v14 = vadd.f32 %v1582_v5, %v1455_v11  ;;  %v1622_v21 = vadd.f32 %v1588_v7, %v3878_v26  ;;  %v2993_v11 = vld [vmem:[%s4586_s4 + $0x1b8] sm:$0xff] }
 0x3be   : > { %v3359_v0 = vpop.f32.mrf.mxu0 }
 0x3bf   : > { %v1598_v9 = vadd.f32 %v3359_v0, %v1470_v58  ;;  %v1621_v24 = vadd.f32 %v1583_v14, %v3883_v27  ;;  %v1626_v49 = vmul.f32 %v3867_v18, %v1622_v21  ;;  %v2986_v27 = vld [vmem:[%s4586_s4 + $0x180] sm:$0xff]  ;;  %v2989_v58 = vld [vmem:[%s4586_s4 + $0x198] sm:$0xff]  ;;  %v2992_v0 = vld [vmem:[%s4586_s4 + $0x1b0] sm:$0xff] }
 0x3c0   : > { %v1592_v12 = vpop.f32.mrf.mxu0  ;;  %3374 = vmatprep.mubr.msk.f32.mxu1 %vm615_vm4, %v2986_v27  ;;  %v3015_v27 = vld [vmem:[%s4586_s4 + $0x1e8] sm:$0xff] }
 0x3c1   : > { %v1624_v17 = vadd.f32 %v1598_v9, %v3870_v22  ;;  %v1593_v16 = vadd.f32 %v1592_v12, %v1465_v59  ;;  %v1625_v22 = vmul.f32 %v3867_v18, %v1621_v24  ;;  %v2990_v59 = vld [vmem:[%s4586_s4 + $0x1a0] sm:$0xff]  ;;  %v3013_v24 = vld [vmem:[%s4586_s4 + $0x1d8] sm:$0xff] }
 0x3c2   : > { %v3010_v12 = vld [vmem:[%s4586_s4 + $0x1c0] sm:$0xff] }
 0x3c3   : > { %v1623_v23 = vadd.f32 %v1593_v16, %v3873_v25  ;;  %v1628_v20 = vmul.f32 %v3867_v18, %v1624_v17  ;;  %v3011_v16 = vld [vmem:[%s4586_s4 + $0x1c8] sm:$0xff] }
 0x3c5   : > { %1643 = vrot.lane.b32.xlu0 %v1628_v20, %s4611_s16  ;;  %v1627_v29 = vmul.f32 %v3867_v18, %v1623_v23  ;;  %v3012_v23 = vld [vmem:[%s4586_s4 + $0x1d0] sm:$0xff] }
 0x3c7   : > { %1641 = vrot.lane.b32.xlu1 %v1627_v29, %s4611_s16  ;;  %v3027_v29 = vld [vmem:[%s4586_s4 + $0x208] sm:$0xff] }
 0x3c9   : > { %1639 = vrot.lane.b32.xlu0 %v1626_v49, %s4611_s16 }
 0x3cb   : > { %1637 = vrot.lane.b32.xlu1 %v1625_v22, %s4611_s16  ;;  %s4613_s16 = smov 126   ;;  %v3014_v22 = vld [vmem:[%s4586_s4 + $0x1e0] sm:$0xff] }
 0x437   : > { %v1644_v26 = vpop.permute.xlu0 %1643 }
 0x438   : > { %1652 = vst.msk [vmem:[#allocation2 + $0x18] sm:$0xff] %vm573_vm3, %v1644_v26  ;;  %v3028_v26 = vld [vmem:[%s4586_s4 + $0x210] sm:$0xff] }
 0x439   : > { %v1642_v25 = vpop.permute.xlu1 %1641 }
 0x43a   : > { %1651 = vst.msk [vmem:[#allocation2 + $0x10] sm:$0xff] %vm573_vm3, %v1642_v25 }
 0x43b   : > { %v1640_v18 = vpop.permute.xlu0 %1639 }
 0x43c   : > { %1650 = vst.msk [vmem:[#allocation2 + $0x8] sm:$0xff] %vm573_vm3, %v1640_v18  ;;  %v3016_v18 = vld [vmem:[%s4586_s4 + $0x1f0] sm:$0xff] }
 0x43d   : > { %v1638_v30 = vpop.permute.xlu1 %1637 }
 0x43e   : > { %1649 = vst.msk [vmem:[#allocation2] sm:$0xff] %vm573_vm3, %v1638_v30  ;;  %v3030_v30 = vld [vmem:[%s4586_s4 + $0x220] sm:$0xff] }
 0x43f   : > { %v1656_v52 = vld [vmem:[#allocation2 + $0x18] sm:$0xff] }
 0x440   : > { %1685 = vrot.lane.b32.xlu0 %v1656_v52, %s4612_s19  ;;  %3386 = vmatprep.subr.mxu0 %v1656_v52 }
 0x441   : > { %3387 = vmatpush3.msra.mxu0 %v1656_v52  ;;  %v1655_v54 = vld [vmem:[#allocation2 + $0x10] sm:$0xff] }
 0x442   : > { %1683 = vrot.lane.b32.xlu1 %v1655_v54, %s4612_s19  ;;  %3388 = vmatprep.subr.mxu0 %v1655_v54 }
 0x443   : > { %3389 = vmatpush3.msra.mxu0 %v1655_v54  ;;  %v1654_v1 = vld [vmem:[#allocation2 + $0x8] sm:$0xff] }
 0x444   : > { %1681 = vrot.lane.b32.xlu0 %v1654_v1, %s4612_s19  ;;  %3390 = vmatprep.subr.mxu0 %v1654_v1 }
 0x445   : > { %3391 = vmatpush3.msra.mxu0 %v1654_v1  ;;  %v1653_v3 = vld [vmem:[#allocation2] sm:$0xff] }
 0x446   : > { %1679 = vrot.lane.b32.xlu1 %v1653_v3, %s4612_s19  ;;  %3392 = vmatprep.subr.mxu0 %v1653_v3  ;;  %s4511_s19 = scalar_lea.hbm %s4593_s11, %s3085_s13 }
 0x447   : > { %3393 = vmatpush3.msra.mxu0 %v1653_v3 }
 0x448   : > { %1964 = vrot.lane.b32.xlu0 %v1656_v52, %s4613_s16  ;;  %3395 = vmatmul.mubr.msk.f32.vlgmr.msra.gmra.mxu0 %vm615_vm4, %v2979_v6  ;;  %v3033_v6 = vld [vmem:[%s4586_s4 + $0x238] sm:$0xff] }
 0x449   : > { %3397 = vmatprep.mubr.msk.f32.mxu0 %vm615_vm4, %v2980_v31  ;;  %v3043_v31 = vld [vmem:[%s4586_s4 + $0x248] sm:$0xff] }
 0x44a   : > { %1962 = vrot.lane.b32.xlu1 %v1655_v54, %s4613_s16 }
 0x44c   : > { %1960 = vrot.lane.b32.xlu0 %v1654_v1, %s4613_s16  ;;  %3398 = vmatmul.mubr.msk.f32.gmra.mxu0 %vm615_vm4, %v2981_v47  ;;  %v3044_v47 = vld [vmem:[%s4586_s4 + $0x250] sm:$0xff] }
 0x44d   : > { %3400 = vmatprep.mubr.msk.f32.mxu0 %vm615_vm4, %v2982_v50  ;;  %v3045_v50 = vld [vmem:[%s4586_s4 + $0x258] sm:$0xff] }
 0x44e   : > { %1958 = vrot.lane.b32.xlu1 %v1653_v3, %s4613_s16  ;;  %s4615_s16 = smov 124  }
 0x450   : > { %2122 = vrot.lane.b32.xlu0 %v1656_v52, %s4614_s26  ;;  %3401 = vmatmul.mubr.msk.f32.gmra.mxu0 %vm615_vm4, %v2983_v8  ;;  %v3046_v8 = vld [vmem:[%s4586_s4 + $0x260] sm:$0xff] }
 0x451   : > { %3403 = vmatprep.mubr.msk.f32.mxu0 %vm615_vm4, %v2984_v62  ;;  %v3047_v62 = vld [vmem:[%s4586_s4 + $0x268] sm:$0xff] }
 0x452   : > { %2118 = vrot.lane.b32.xlu1 %v1654_v1, %s4614_s26 }
 0x454   : > { %2280 = vrot.lane.b32.xlu0 %v1656_v52, %s4615_s16  ;;  %3404 = vmatmul.mubr.msk.f32.gmra.mxu0 %vm615_vm4, %v2985_v19  ;;  %v3017_v52 = vld [vmem:[%s4586_s4 + $0x1f8] sm:$0xff]  ;;  %v3048_v19 = vld [vmem:[%s4586_s4 + $0x270] sm:$0xff] }
 0x455   : > { %3434 = vmatprep.mubr.msk.f32.mxu0 %vm615_vm4, %v3026_v28  ;;  %v3049_v28 = vld [vmem:[%s4586_s4 + $0x278] sm:$0xff] }
 0x456   : > { %2120 = vrot.lane.b32.xlu1 %v1655_v54, %s4614_s26 }
 0x458   : > { %2278 = vrot.lane.b32.xlu0 %v1655_v54, %s4615_s16  ;;  %v3031_v54 = vld [vmem:[%s4586_s4 + $0x228] sm:$0xff] }
 0x45a   : > { %2116 = vrot.lane.b32.xlu1 %v1653_v3, %s4614_s26 }
 0x45c   : > { %2276 = vrot.lane.b32.xlu0 %v1654_v1, %s4615_s16  ;;  %v3032_v1 = vld [vmem:[%s4586_s4 + $0x230] sm:$0xff] }
 0x45e   : > { %2274 = vrot.lane.b32.xlu1 %v1653_v3, %s4615_s16  ;;  %v3042_v3 = vld [vmem:[%s4586_s4 + $0x240] sm:$0xff] }
 0x460   : > { %2469 = vperm.xlu0 %3543, %v3065_v48   ;;  %v3070_v48 = vld [vmem:[%s4588_s6 + $0x40] sm:$0xff] }
 0x462   : > { %2464 = vperm.xlu1 %3544, %v3064_v51   ;;  %v4423_v51 = vpop.f32.mrf.mxu0 }
 0x464   : > { %2459 = vperm.xlu0 %3543, %v3063_v2   ;;  %v4425_v2 = vpop.f32.mrf.mxu0 }
 0x466   : > { %2454 = vperm.xlu1 %3544, %v3062_v32   ;;  %v4427_v32 = vpop.f32.mrf.mxu0 }
 0x468   : > { %2449 = vperm.xlu0 %3543, %v3061_v63   ;;  %v4429_v63 = vpop.f32.mrf.mxu0 }
 0x46a   : > { %2444 = vperm.xlu1 %3544, %v3060_v13  }
 0x46c   : > { %2439 = vperm.xlu0 %3543, %v3059_v4  }
 0x46e   : > { %2434 = vperm.xlu1 %3544, %v3058_v33  }
 0x470   : > { %1489 = vperm.xlu0 %3543, %v1451_v34  }
 0x472   : > { %2539 = vperm.xlu1 %3544, %v3077_v35  }
 0x474   : > { %1484 = vperm.xlu0 %3543, %v1450_v15  }
 0x476   : > { %2534 = vperm.xlu1 %3544, %v3076_v36  }
 0x478   : > { %1479 = vperm.xlu0 %3543, %v1449_v37  }
 0x47a   : > { %2529 = vperm.xlu1 %3544, %v3075_v38  }
 0x47c   : > { %1474 = vperm.xlu0 %3543, %v1448_v39  }
 0x47e   : > { %2524 = vperm.xlu1 %3544, %v3074_v40  }
 0x480   : > { %2651 = vperm.xlu0 %3543, %v2648_v41  }
 0x4b2   : > { %v1686_v42 = vpop.permute.xlu0 %1685 }
 0x4b3   : > { %3366 = vmatprep.subr.mxu1 %v1686_v42 }
 0x4b4   : > { %3367 = vmatpush3.msra.mxu1 %v1686_v42  ;;  %v1684_v43 = vpop.permute.xlu1 %1683 }
 0x4b5   : > { %3368 = vmatprep.subr.mxu1 %v1684_v43 }
 0x4b6   : > { %v1682_v44 = vpop.permute.xlu0 %1681  ;;  %3369 = vmatpush3.msra.mxu1 %v1684_v43 }
 0x4b7   : > { %3370 = vmatprep.subr.mxu1 %v1682_v44 }
 0x4b8   : > { %3371 = vmatpush3.msra.mxu1 %v1682_v44  ;;  %v1680_v45 = vpop.permute.xlu1 %1679 }
 0x4b9   : > { %3372 = vmatprep.subr.mxu1 %v1680_v45 }
 0x4ba   : > { %v1965_v56 = vpop.permute.xlu0 %1964  ;;  %3373 = vmatpush3.msra.mxu1 %v1680_v45 }
 0x4bb   : > { %3375 = vmatmul.mubr.msk.f32.vlgmr.msra.gmra.mxu1 %vm615_vm4, %v2987_v46  ;;  %3406 = vmatprep.subr.mxu1 %v1965_v56 }
 0x4bc   : > { %3407 = vmatpush3.msra.mxu1 %v1965_v56  ;;  %v1963_v57 = vpop.permute.xlu1 %1962  ;;  %3377 = vmatprep.mubr.msk.f32.mxu1 %vm615_vm4, %v2988_v55 }
 0x4bd   : > { %3408 = vmatprep.subr.mxu1 %v1963_v57 }
 0x4be   : > { %v1961_v61 = vpop.permute.xlu0 %1960  ;;  %3409 = vmatpush3.msra.mxu1 %v1963_v57 }
 0x4bf   : > { %3378 = vmatmul.mubr.msk.f32.gmra.mxu1 %vm615_vm4, %v2989_v58  ;;  %3410 = vmatprep.subr.mxu1 %v1961_v61 }
 0x4c0   : > { %3411 = vmatpush3.msra.mxu1 %v1961_v61  ;;  %v1959_v5 = vpop.permute.xlu1 %1958  ;;  %3380 = vmatprep.mubr.msk.f32.mxu1 %vm615_vm4, %v2990_v59 }
 0x4c1   : > { %3412 = vmatprep.subr.mxu1 %v1959_v5 }
 0x4c2   : > { %v2123_v7 = vpop.permute.xlu0 %2122  ;;  %3413 = vmatpush3.msra.mxu1 %v1959_v5 }
 0x4c3   : > { %3381 = vmatmul.mubr.msk.f32.gmra.mxu1 %vm615_vm4, %v2991_v60  ;;  %3426 = vmatprep.subr.mxu0 %v2123_v7 }
 0x4c4   : > { %3427 = vmatpush3.msra.mxu0 %v2123_v7  ;;  %v2119_v9 = vpop.permute.xlu1 %2118  ;;  %3383 = vmatprep.mubr.msk.f32.mxu1 %vm615_vm4, %v2992_v0 }
 0x4c6   : > { %v2281_v14 = vpop.permute.xlu0 %2280 }
 0x4c7   : > { %3384 = vmatmul.mubr.msk.f32.gmra.mxu1 %vm615_vm4, %v2993_v11  ;;  %3446 = vmatprep.subr.mxu1 %v2281_v14 }
 0x4c8   : > { %v2121_v17 = vpop.permute.xlu1 %2120  ;;  %3414 = vmatprep.mubr.msk.f32.mxu1 %vm615_vm4, %v3010_v12 }
 0x4c9   : > { %3428 = vmatprep.subr.mxu0 %v2121_v17 }
 0x4ca   : > { %v2279_v21 = vpop.permute.xlu0 %2278  ;;  %3429 = vmatpush3.msra.mxu0 %v2121_v17 }
 0x4cb   : > { %3415 = vmatmul.mubr.msk.f32.vlgmr.msra.gmra.mxu1 %vm615_vm4, %v3011_v16  ;;  %3430 = vmatprep.subr.mxu0 %v2119_v9 }
 0x4cc   : > { %3447 = vmatpush3.msra.mxu1 %v2281_v14  ;;  %3431 = vmatpush3.msra.mxu0 %v2119_v9  ;;  %v2117_v20 = vpop.permute.xlu1 %2116 }
 0x4cd   : > { %3448 = vmatprep.subr.mxu1 %v2279_v21  ;;  %3432 = vmatprep.subr.mxu0 %v2117_v20 }
 0x4ce   : > { %3449 = vmatpush3.msra.mxu1 %v2279_v21  ;;  %v2277_v49 = vpop.permute.xlu0 %2276  ;;  %3417 = vmatprep.mubr.msk.f32.mxu1 %vm615_vm4, %v3012_v23 }
 0x4cf   : > { %3433 = vmatpush3.msra.mxu0 %v2117_v20  ;;  %3418 = vmatmul.mubr.msk.f32.gmra.mxu1 %vm615_vm4, %v3013_v24 }
 0x4d0   : > { %3435 = vmatmul.mubr.msk.f32.vlgmr.msra.gmra.mxu0 %vm615_vm4, %v3027_v29  ;;  %3450 = vmatprep.subr.mxu1 %v2277_v49  ;;  %v2275_v25 = vpop.permute.xlu1 %2274 }
 0x4d1   : > { %3451 = vmatpush3.msra.mxu1 %v2277_v49  ;;  %3420 = vmatprep.mubr.msk.f32.mxu1 %vm615_vm4, %v3014_v22 }
 0x4d2   : > { %3452 = vmatprep.subr.mxu1 %v2275_v25  ;;  %3437 = vmatprep.mubr.msk.f32.mxu0 %vm615_vm4, %v3028_v26 }
 0x4d3   : > { %3453 = vmatpush3.msra.mxu1 %v2275_v25 }
 0x4d4   : > { %3421 = vmatmul.mubr.msk.f32.gmra.mxu1 %vm615_vm4, %v3015_v27  ;;  %3438 = vmatmul.mubr.msk.f32.gmra.mxu0 %vm615_vm4, %v3029_v53 }
 0x4d5   : > { %3423 = vmatprep.mubr.msk.f32.mxu1 %vm615_vm4, %v3016_v18  ;;  %3440 = vmatprep.mubr.msk.f32.mxu0 %vm615_vm4, %v3030_v30 }
 0x4d8   : > { %3424 = vmatmul.mubr.msk.f32.gmra.mxu1 %vm615_vm4, %v3017_v52  ;;  %3441 = vmatmul.mubr.msk.f32.gmra.mxu0 %vm615_vm4, %v3031_v54 }
 0x4d9   : > { %3443 = vmatprep.mubr.msk.f32.mxu0 %vm615_vm4, %v3032_v1  ;;  %3454 = vmatprep.mubr.msk.f32.mxu1 %vm615_vm4, %v3042_v3 }
 0x4db   : > { %v2470_v16 = vpop.permute.xlu0 %2469 }
 0x4dc   : > { %3444 = vmatmul.mubr.msk.f32.gmra.mxu0 %vm615_vm4, %v3033_v6  ;;  %3455 = vmatmul.mubr.msk.f32.vlgmr.msra.gmra.mxu1 %vm615_vm4, %v3043_v31 }
 0x4dd   : > { %3457 = vmatprep.mubr.msk.f32.mxu1 %vm615_vm4, %v3044_v47  ;;  %3474 = vmatprep.mubr.msk.f32.mxu0 %vm615_vm4, %v3070_v48  ;;  %v2465_v20 = vpop.permute.xlu1 %2464 }
 0x4df   : > { %v2460_v18 = vpop.permute.xlu0 %2459 }
 0x4e0   : > { %3458 = vmatmul.mubr.msk.f32.gmra.mxu1 %vm615_vm4, %v3045_v50 }
 0x4e1   : > { %3460 = vmatprep.mubr.msk.f32.mxu1 %vm615_vm4, %v3046_v8 }
 0x4e4   : > { %3461 = vmatmul.mubr.msk.f32.gmra.mxu1 %vm615_vm4, %v3047_v62  ;;  %v2455_v62 = vpop.permute.xlu1 %2454 }
 0x4e5   : > { %3463 = vmatprep.mubr.msk.f32.mxu1 %vm615_vm4, %v3048_v19 }
 0x4e8   : > { %3464 = vmatmul.mubr.msk.f32.gmra.mxu1 %vm615_vm4, %v3049_v28 }
 0x508   : > { %v4431_v13 = vpop.f32.mrf.mxu0 }
 0x50a   : > { %v4433_v4 = vpop.f32.mrf.mxu0 }
 0x50c   : > { %v4435_v33 = vpop.f32.mrf.mxu0 }
 0x50e   : > { %v4441_v15 = vpop.f32.mrf.mxu0 }
 0x510   : > { %v3402_v38 = vpop.f32.mrf.mxu0 }
 0x512   : > { %v1930_v41 = vpop.f32.mrf.mxu0 }
 0x514   : > { %v3405_v44 = vpop.f32.mrf.mxu0 }
 0x516   : > { %v1940_v55 = vpop.f32.mrf.mxu0 }
 0x57b   : > { %v4437_v34 = vpop.f32.mrf.mxu1 }
 0x57d   : > { %v4439_v35 = vpop.f32.mrf.mxu1 }
 0x57f   : > { %v4443_v36 = vpop.f32.mrf.mxu1 }
 0x581   : > { %v4445_v37 = vpop.f32.mrf.mxu1 }
 0x583   : > { %v3382_v39 = vpop.f32.mrf.mxu1 }
 0x584   : > { %v1936_v21 = vadd.f32 %v3402_v38, %v3382_v39 }
 0x585   : > { %v1801_v40 = vpop.f32.mrf.mxu1 }
 0x586   : > { %v1931_v24 = vadd.f32 %v1930_v41, %v1801_v40 }
 0x587   : > { %v3385_v42 = vpop.f32.mrf.mxu1 }
 0x588   : > { %v1946_v26 = vadd.f32 %v3405_v44, %v3385_v42 }
 0x589   : > { %v1811_v43 = vpop.f32.mrf.mxu1 }
 0x58a   : > { %v1941_v30 = vadd.f32 %v1940_v55, %v1811_v43 }
 0x58b   : > { %v4447_v45 = vpop.f32.mrf.mxu1 }
 0x58d   : > { %v4449_v46 = vpop.f32.mrf.mxu1 }
 0x58f   : > { %v3419_v56 = vpop.f32.mrf.mxu1 }
 0x590   : > { %v4451_v57 = vpop.f32.mrf.mxu0 }
 0x591   : > { %v2070_v58 = vpop.f32.mrf.mxu1 }
 0x592   : > { %v4453_v59 = vpop.f32.mrf.mxu0 }
 0x594   : > { %v3422_v61 = vpop.f32.mrf.mxu1  ;;  %v3439_v5 = vpop.f32.mrf.mxu0 }
 0x595   : > { %v2104_v29 = vadd.f32 %v3422_v61, %v1936_v21  ;;  %v1926_v61 = vadd.f32 %v4435_v33, %v4443_v36  ;;  %v1911_v33 = vadd.f32 %v4433_v4, %v4439_v35 }
 0x596   : > { %v2080_v60 = vpop.f32.mrf.mxu1  ;;  %v2228_v0 = vpop.f32.mrf.mxu0 }
 0x597   : > { %v2103_v25 = vadd.f32 %v2080_v60, %v1931_v24 }
 0x598   : > { %v3425_v7 = vpop.f32.mrf.mxu1  ;;  %v3442_v9 = vpop.f32.mrf.mxu0 }
 0x599   : > { %v2262_v27 = vadd.f32 %v3442_v9, %v2104_v29  ;;  %v2106_v52 = vadd.f32 %v3425_v7, %v1946_v26  ;;  %v1921_v7 = vadd.f32 %v4441_v15, %v4445_v37  ;;  %v2102_v9 = vadd.f32 %v3419_v56, %v1926_v61  ;;  %v2445_v15 = vpop.permute.xlu1 %2444 }
 0x59a   : > { %v2090_v11 = vpop.f32.mrf.mxu1  ;;  %v2238_v14 = vpop.f32.mrf.mxu0  ;;  %v2099_v37 = vadd.f32 %v4449_v46, %v1911_v33 }
 0x59b   : > { %v2261_v54 = vadd.f32 %v2238_v14, %v2103_v25  ;;  %v2105_v31 = vadd.f32 %v2090_v11, %v1941_v30  ;;  %v2101_v11 = vadd.f32 %v2070_v58, %v1921_v7  ;;  %v2260_v14 = vadd.f32 %v3439_v5, %v2102_v9 }
 0x59c   : > { %v3456_v12 = vpop.f32.mrf.mxu1  ;;  %v3445_v49 = vpop.f32.mrf.mxu0 }
 0x59d   : > { %v2264_v47 = vadd.f32 %v3445_v49, %v2106_v52  ;;  %v2259_v21 = vadd.f32 %v2228_v0, %v2101_v11  ;;  %v2450_v49 = vpop.permute.xlu0 %2449  ;;  %v2435_v46 = vpop.permute.xlu1 %2434 }
 0x59e   : > { %v4455_v17 = vpop.f32.mrf.mxu1  ;;  %v2248_v3 = vpop.f32.mrf.mxu0 }
 0x59f   : > { %v2263_v28 = vadd.f32 %v2248_v3, %v2105_v31 }
 0x5a0   : > { %v3459_v23 = vpop.f32.mrf.mxu1 }
 0x5a1   : > { %v2418_v24 = vadd.f32 %v3459_v23, %v2260_v14 }
 0x5a2   : > { %v2386_v22 = vpop.f32.mrf.mxu1 }
 0x5a3   : > { %v2417_v29 = vadd.f32 %v2386_v22, %v2259_v21  ;;  %v2475_v56 = vadd.f32 %v2450_v49, %v2418_v24  ;;  %v4489_v49 = vld [vmem:[%s3864_s29] ss:$0 sm:$0xff]  ;;  %s3697_s29 = smov [#allocation5]  }
 0x5a4   : > { %v3462_v53 = vpop.f32.mrf.mxu1  ;;  %s3601_s26 = sshll.u32 %s3697_s29, 4  ;;  %s3602_s26 = int_to_ptr.vmem [resolvable:$false] %s3601_s26 }
 0x5a5   : > { %v2420_v1 = vadd.f32 %v3462_v53, %v2262_v27  ;;  %v2474_v5 = vadd.f32 %v2445_v15, %v2417_v29  ;;  %s3603_s13 = scalar_lea.vmem %s3602_s26, 32  ;;  %p3604_p0 = scmp.lt.s32.totalorder %s4513_s22, %s3602_s26 }
 0x5a6   : > { %v2396_v6 = vpop.f32.mrf.mxu1  ;;  %p3605_p1 = scmp.lt.s32.totalorder %s3603_s13, %s3597_s14 }
 0x5a7   : > { %v2477_v50 = vadd.f32 %v2460_v18, %v2420_v1  ;;  %v2419_v8 = vadd.f32 %v2396_v6, %v2261_v54 }
 0x5a8   : > { %v3465_v19 = vpop.f32.mrf.mxu1  ;;  %p3606_p2 = por %p3605_p1, %p3604_p0 }
 0x5a9   : > { %v3067_v48 = vmul.f32 -1.442695, %v2477_v50  ;;  %v2476_v38 = vadd.f32 %v2455_v62, %v2419_v8  ;;  %v2422_v39 = vadd.f32 %v3465_v19, %v2264_v47  ;;  %v3071_v50 = vld [vmem:[%s4588_s6 + $0x48] sm:$0xff]  ;;  %v3072_v8 = vld [vmem:[%s4588_s6 + $0x50] sm:$0xff]  ;;  %v3073_v62 = vld [vmem:[%s4588_s6 + $0x58] sm:$0xff] }
 0x5aa   : > { %v2406_v40 = vpop.f32.mrf.mxu1  ;;  %p3607_p3 = pnand %p3606_p2, %p3600_p13 }
 0x5ab   : > { %v3066_v41 = vmul.f32 -1.442695, %v2476_v38  ;;  %v2479_v42 = vadd.f32 %v2470_v16, %v2422_v39  ;;  %v2421_v44 = vadd.f32 %v2406_v40, %v2263_v28  ;;  %3569 = vpow2.f32 %v3067_v48  ;;  %v2540_v28 = vpop.permute.xlu1 %2539 }
 0x5ac   : > { %v1916_v16 = vadd.f32 %v4431_v13, %v4437_v34  ;;  %v2257_v13 = vadd.f32 %v4453_v59, %v2099_v37 }
 0x5ad   : > { %v3069_v43 = vmul.f32 -1.442695, %v2479_v42  ;;  %v2478_v55 = vadd.f32 %v2465_v20, %v2421_v44  ;;  %3571 = vpow2.f32 %v3066_v41 }
 0x5ae   : > { %v2100_v20 = vadd.f32 %v4447_v45, %v1916_v16  ;;  %v2440_v45 = vpop.permute.xlu0 %2439  ;;  %v2415_v23 = vadd.f32 %v4455_v17, %v2257_v13 }
 0x5af   : > { %3573 = vpow2.f32 %v3069_v43  ;;  %v3068_v60 = vmul.f32 -1.442695, %v2478_v55  ;;  %v2535_v38 = vpop.permute.xlu1 %2534 }
 0x5b0   : > { %v2258_v36 = vadd.f32 %v4451_v57, %v2100_v20 }
 0x5b1   : > { %3575 = vpow2.f32 %v3068_v60 }
 0x5b2   : > { %v2416_v58 = vadd.f32 %v3456_v12, %v2258_v36  ;;  %3577 = vtanh.f32 %v2475_v56  ;;  %v2472_v12 = vadd.f32 %v2435_v46, %v2415_v23  ;;  %v1490_v19 = vpop.permute.xlu0 %1489 }
 0x5b3   : > { %3579 = vtanh.f32 %v2474_v5  ;;  %v2530_v40 = vpop.permute.xlu1 %2529  ;;  %v1618_v43 = vadd.f32 %v4427_v32, %v1490_v19 }
 0x5b4   : > { %v2473_v35 = vadd.f32 %v2440_v45, %v2416_v58 }
 0x5b6   : > { %v1485_v48 = vpop.permute.xlu0 %1484 }
 0x5b7   : > { %v1613_v7 = vadd.f32 %v4429_v63, %v1485_v48  ;;  %v2525_v9 = vpop.permute.xlu1 %2524 }
 0x5b8   : > { %v3570_v26 = vpop.eup %3569 }
 0x5b9   : > { %v2497_v0 = vadd.f32 1.0, %v3570_v26 }
 0x5ba   : > { %v3572_v25 = vpop.eup %3571  ;;  %v1480_v39 = vpop.permute.xlu0 %1479 }
 0x5bb   : > { %v2496_v57 = vadd.f32 1.0, %v3572_v25  ;;  %v1608_v14 = vadd.f32 %v4423_v51, %v1480_v39 }
 0x5bc   : > { %v3574_v34 = vpop.eup %3573 }
 0x5bd   : > { %v2499_v22 = vadd.f32 1.0, %v3574_v34 }
 0x5be   : > { %v3576_v4 = vpop.eup %3575  ;;  %v1475_v55 = vpop.permute.xlu0 %1474 }
 0x5bf   : > { %3581 = vrcp.f32 %v2499_v22  ;;  %v2498_v27 = vadd.f32 1.0, %v3576_v4  ;;  %v3578_v59 = vpop.eup %3577  ;;  %v1603_v20 = vadd.f32 %v4425_v2, %v1475_v55  ;;  %v2647_v2 = vld [vmem:[%s4590_s8] sm:$0xf] }
 0x5c0   : > { %3583 = vrcp.f32 %v2497_v0  ;;  %v3580_v53 = vpop.eup %3579 }
 0x5c1   : > { %3585 = vrcp.f32 %v2498_v27 }
 0x5c2   : > { %3587 = vtanh.f32 %v2473_v35  ;;  %v2652_v15 = vpop.permute.xlu0 %2651 }
 0x5c3   : > { %3589 = vrcp.f32 %v2496_v57  ;;  %v3596_v57 = vld [vmem:[%s3828_s12] sm:$0xf] }
 0x5c4   : > { %3591 = vtanh.f32 %v2472_v12 }
 0x5cc   : > { %v3582_v18 = vpop.eup %3581 }
 0x5cd   : > { %v3584_v30 = vpop.eup %3583  ;;  %v2511_v17 = vmul.f32 %v3582_v18, %v3578_v59 }
 0x5ce   : > { %v3586_v52 = vpop.eup %3585 }
 0x5cf   : > { %v3588_v54 = vpop.eup %3587  ;;  %3466 = vmatprep.subr.mxu0 %v2511_v17  ;;  %v2510_v1 = vmul.f32 %v3586_v52, %v3580_v53 }
 0x5d0   : > { %v3590_v3 = vpop.eup %3589  ;;  %3467 = vmatpush3.msra.mxu0 %v2511_v17  ;;  %v2509_v6 = vmul.f32 %v3588_v54, %v3584_v30 }
 0x5d1   : > { %3468 = vmatprep.subr.mxu0 %v2510_v1  ;;  %v3592_v31 = vpop.eup %3591 }
 0x5d2   : > { %3469 = vmatpush3.msra.mxu0 %v2510_v1  ;;  %v2508_v47 = vmul.f32 %v3592_v31, %v3590_v3 }
 0x5d3   : > { %3470 = vmatprep.subr.mxu0 %v2509_v6 }
 0x5d4   : > { %3471 = vmatpush3.msra.mxu0 %v2509_v6 }
 0x5d5   : > { %3472 = vmatprep.subr.mxu0 %v2508_v47 }
 0x5d6   : > { %3473 = vmatpush3.msra.mxu0 %v2508_v47 }
 0x5d7   : > { %3475 = vmatmul.mubr.msk.f32.vlgmr.msra.gmra.mxu0 %vm615_vm4, %v3071_v50  ;;  %3480 = vmatprep.subr.mxu0 %v3690_v10 }
 0x5d8   : > { %3477 = vmatprep.mubr.msk.f32.mxu0 %vm615_vm4, %v3072_v8 }
 0x5db   : > { %3478 = vmatmul.mubr.msk.f32.gmra.mxu0 %vm615_vm4, %v3073_v62 }
 0x5dc   : > { %3488 = vmatprep.mubr.msk.f32.mxu0 %vm3696_vm5, %v3690_v10 }
 0x697   : > { %v3476_v41 = vpop.f32.mrf.mxu0 }
 0x698   : > { %v2626_v61 = vadd.f32 %v3476_v41, %v2530_v40 }
 0x699   : > { %v2620_v42 = vpop.f32.mrf.mxu0 }
 0x69a   : > { %v2621_v16 = vadd.f32 %v2620_v42, %v2525_v9  ;;  %v2640_v29 = vadd.f32 %v2626_v61, %v1608_v14 }
 0x69b   : > { %v3479_v44 = vpop.f32.mrf.mxu0 }
 0x69c   : > { %v2636_v60 = vadd.f32 %v3479_v44, %v2540_v28  ;;  %v2639_v36 = vadd.f32 %v2621_v16, %v1603_v20  ;;  %v2644_v63 = vmul.f32 %v4489_v49, %v2640_v29 }
 0x69d   : > { %v2630_v11 = vpop.f32.mrf.mxu0 }
 0x69e   : > { %v2642_v21 = vadd.f32 %v2636_v60, %v1618_v43  ;;  %v2631_v24 = vadd.f32 %v2630_v11, %v2535_v38  ;;  %v2643_v51 = vmul.f32 %v4489_v49, %v2639_v36 }
 0x6a0   : > { %v2646_v33 = vmul.f32 %v4489_v49, %v2642_v21  ;;  %v2641_v32 = vadd.f32 %v2631_v24, %v1613_v7 }
 0x6a2   : > { %v2645_v26 = vmul.f32 %v4489_v49, %v2641_v32  ;;  %3481 = vmatpush3.msra.mxu0 %v2646_v33 }
 0x6a3   : > { %3482 = vmatprep.subr.mxu0 %v3690_v10 }
 0x6a4   : > { %3483 = vmatpush3.msra.mxu0 %v2645_v26 }
 0x6a5   : > { %3484 = vmatprep.subr.mxu0 %v3690_v10 }
 0x6a6   : > { %3485 = vmatpush3.msra.mxu0 %v2644_v63 }
 0x6a7   : > { %3486 = vmatprep.subr.mxu0 %v3690_v10 }
 0x6a8   : > { %3487 = vmatpush3.msra.mxu0 %v2643_v51 }
 0x6a9   : > { %3489 = vmatmul.mubr.msk.f32.vlgmr.msra.gmra.mxu0 %vm615_vm4, %v2647_v2 }
 0x769   : > { %v2723_v37 = vpop.f32.mrf.mxu0 }
 0x76a   : > { %v2724_v56 = vadd.f32 %v2723_v37, %v2652_v15 }
 0x76b   : > { %v3490_v58 = vpop.f32.mrf.mxu0 }
 0x76c   : > { %v2727_v5 = vmul.f32 %v4489_v49, %v2724_v56 }
 0x76e   : > { %v2728_v25 = vmul.f32 1.442695, %v2727_v5  ;;  %v2737_v13 = vrot.slane %v2727_v5, 2 }
 0x770   : > { %3593 = vpow2.f32 %v2728_v25  ;;  %v2740_v34 = vsel %vm2739_vm6, %v2737_v13, 0.0 }
 0x771   : > { %v2741_v0 = vrot.slane %v2740_v34, 4 }
 0x773   : > { %v2742_v45 = vadd.f32 %v2741_v0, %v2740_v34 }
 0x775   : > { %v2743_v10 = vrot.slane %v2742_v45, 2 }
 0x777   : > { %v2744_v23 = vadd.f32 %v2743_v10, %v2742_v45 }
 0x779   : > { %v2745_v22 = vrot.slane %v2744_v23, 1 }
 0x77b   : > { %v2746_v4 = vadd.f32 %v2745_v22, %v2744_v23 }
 0x77d   : > { %v3594_v35 = vpop.eup %3593  ;;  %2748 = vst.msk [vmem:[%s398_s15] sm:$0x1] %vm2747_vm7, %v2746_v4 }
 0x77e   : > { %v2730_v27 = vmul.f32 %v3596_v57, %v3594_v35 }
 0x77f   : > { %3610 = shalt.err (!%p3607_p3)
}
 0x780   : > { %s3611_s12 = scalar_lea.hbm %s4511_s19, 16  ;;  %s3615_s29 = scalar_lea.hbm %s4593_s11, 32 }
 0x781   : > { %p3612_p4 = scmp.ne.s32.totalorder %s4511_s19, %s3611_s12  ;;  %p3616_p9 = scmp.lt.s32.totalorder %s4511_s19, %s4593_s11 }
 0x782   : > { %p3617_p10 = scmp.lt.s32.totalorder %s3615_s29, %s3611_s12 }
 0x783   : > { %p3613_p7 = pnand %p3612_p4, %p3797_p5 }
 0x784   : > { %p3618_p11 = por %p3617_p10, %p3616_p9 }
 0x785   : > { %p3614_p8 = pneg %p3613_p7 }
 0x787   : > { %p3619_p12 = pnand %p3618_p11, %p3614_p8 }
 0x789   : > { %3622 = shalt.err (!%p3619_p12)
}
 0x78a   : > { %3492 = dma.vmem_to_hbm [thread:$0]  (%p3797_p5), %s4513_s22, 16, %s4511_s19, %s2761_s24   ;;  %v2731_v46 = vmul.f32 %v4489_v49, %v2730_v27  ;;  %vm2753_vm8 = vcmask 125952  }
 0x78b   : > { %s3084_s14 = sshll.u32 %s3780_s21, 6  ;;  %s4616_s0 = sshll.u32 %s4504_s30, 2 }
 0x78c   : > { %v2733_v12 = vrot.slane %v2731_v46, 2  ;;  %s392_s16 = scalar_lea.vmem [#allocation3], %s4616_s0  ;;  %s4545_s15 = scalar_lea.hbm %s4592_s10, %s3084_s14 }
 0x78d   : > { %s2773_s26 = sshll.u32 %s392_s16, 4  ;;  %s2756_s22 = scalar_lea.sflag [#allocation4], %s4504_s30  ;;  %s2774_s26 = int_to_ptr.vmem [resolvable:$true] %s2773_s26 }
 0x78e   : > { %v2735_v59 = vadd.f32 %v2733_v12, %v2727_v5  ;;  %s3623_s19 = scalar_lea.vmem %s2774_s26, 64  ;;  %s3698_s21 = smov [#allocation3]  }
 0x78f   : > { %p3624_p13 = scmp.ne.s32.totalorder %s2774_s26, %s3623_s19  ;;  %s3627_s24 = sshll.u32 %s3698_s21, 4  ;;  %s3628_s24 = int_to_ptr.vmem [resolvable:$false] %s3627_s24 }
 0x790   : > { %v2750_v53 = vrot.slane %v2735_v59, 6  ;;  %s3629_s25 = scalar_lea.vmem %s3628_s24, 128  ;;  %p3630_p2 = scmp.lt.s32.totalorder %s2774_s26, %s3628_s24 }
 0x791   : > { %p3625_p0 = pnand %p3624_p13, %p3797_p5  ;;  %p3631_p3 = scmp.lt.s32.totalorder %s3629_s25, %s3623_s19 }
 0x792   : > { %v2752_v18 = vsel %vm458_vm1, %v3596_v57, %v2750_v53 }
 0x793   : > { %2754 = vst.msk [vmem:[%s392_s16] sm:$0xf] %vm2753_vm8, %v2752_v18  ;;  %p3626_p1 = pneg %p3625_p0  ;;  %p3632_p4 = por %p3631_p3, %p3630_p2 }
 0x795   : > { %p3633_p7 = pnand %p3632_p4, %p3626_p1 }
 0x797   : > { %3636 = shalt.err (!%p3633_p7)
}
 0x798   : > { %s3637_s29 = scalar_lea.hbm %s4545_s15, 64  ;;  %s3641_s0 = scalar_lea.hbm %s4592_s10, 128 }
 0x799   : > { %p3638_p8 = scmp.ne.s32.totalorder %s4545_s15, %s3637_s29  ;;  %p3642_p11 = scmp.lt.s32.totalorder %s4545_s15, %s4592_s10 }
 0x79a   : > { %p3643_p12 = scmp.lt.s32.totalorder %s3641_s0, %s3637_s29 }
 0x79b   : > { %p3639_p9 = pnand %p3638_p8, %p3797_p5 }
 0x79c   : > { %p3644_p13 = por %p3643_p12, %p3642_p11 }
 0x79d   : > { %p3640_p10 = pneg %p3639_p9 }
 0x79f   : > { %p3645_p0 = pnand %p3644_p13, %p3640_p10 }
 0x7a1   : > { %3648 = shalt.err (!%p3645_p0)
}
 0x7a2   : > { %3491 = dma.vmem_to_hbm [thread:$0]  (%p3797_p5), %s2774_s26, 64, %s4545_s15, %s2756_s22  }
 0x7a3 PF: > { %p3502_p1 = scmp.ge.s32.totalorder %s3687_s20, 2  ;;  %s2798_s12 = sand.u32 1, %s3675_s17  }
 0x7a4   : > { %s2799_s19 = scalar_lea.sflag [#allocation4], %s2798_s12 }
 0x7a5   : > { %p3496_p2 = pnand %p3502_p1, %p3801_p6 }
 0x7a7   : > { %p3497_p3 = pneg %p3496_p2 }
 0x7a9   : > { %3666 = dma.done.wait (%p3497_p3), %s2799_s19, 64  }
 0x7aa   : > { %3668 = vsyncadd (%p3497_p3), %s2799_s19, 4294967232  ;;  %s2808_s21 = scalar_lea.sflag [#allocation6], %s2798_s12 }
 0x7ab   : > { %3670 = dma.done.wait (%p3497_p3), %s2808_s21, 16  }
 0x7ac   : > { %3672 = vsyncadd (%p3497_p3), %s2808_s21, 4294967280  ;;  %s4617_s27 = sld [smem:[#allocation9_spill]]  ;;  %p25_p5 = scmp.ge.s32.totalorder %s3784_s23, 4  }
 0x7ad   : > { %s4618_s19 = sld [smem:[#allocation10_spill]]  ;;  %s4619_s17 = smov %s3679_s18 }
 0x7ae   : > { %s4621_s20 = smov %s3784_s23  ;;  %27 = sbr.rel (!%p25_p5) target bundleno = 7 (0x7), region = 127 }
 0x7b2   : > { %s4620_s18 = smov %s4617_s27 }
 0x7b3   :  { %2812 = vsyncpa [#allocation4], 1 }
 0x7b4   :  { %2814 = vsyncpa [#allocation4 + $0x1], 1 }
 0x7b5   :  { %2815 = vsyncpa [#allocation6], 1 }
 0x7b6   :  { %2817 = vsyncpa [#allocation6 + $0x1], 1 }

</bundles_post_ra>
